<compile_context>
chip_gen: v7x
topology: tpu7x:2x2x1
jax: 0.10.0
libtpu: 0.0.40
codegen_flags: <defaults>
</compile_context>

<pallas_src>
import numpy as np
import jax
import jax.numpy as jnp
from jax.experimental import pallas as pl
from jax.experimental.pallas import tpu as pltpu


def _silu(x):
    return x * jax.nn.sigmoid(x)


def _round_up(x, m):
    return ((x + m - 1) // m) * m


def egnn_kernel(
    # per-row data tiles
    hst_ref,      # [TM, H]
    hn_ref,       # [TM, K*H]     neighbor features, lane-dense
    aux_ref,      # [TM, 4K+6]    = [dist(K) | mask(K) | rx(K) | ry(K) | ped(6)]
    # f_e (layer-1 weights tiled / block-diagonalised over the K neighbors)
    we1h_t_ref,   # [H,  KH]  tile_K(we1[:H])
    we1n_bd_ref,  # [KH, KH]  blockdiag_K(we1[H:2H])
    w_dm_ref,     # [2K, 2KH] blockdiag(dist->we1d projection, mask->1 indicator)
    be1_t_ref,    # [1, KH]
    we2_bd_ref,   # [KH, KH]
    be2_t_ref,    # [1, KH]
    # f_x
    wx1_bd_ref,   # [KH, KH]
    bx1_t_ref,    # [1, KH]
    wx2_b_ref,    # [KH, K]   block columns of wx2
    bx2_ref,      # [1, 1]
    # f_a
    wa1_ref, ba1_ref, wa2t_ref, ba2_ref,               # [H,H],[1,H],[1,H],[1,1]
    # f_h
    wh1h_ref, wh1m_t_ref, bh1_ref, wh2_ref, bh2_ref,   # [H,H],[KH,H],[1,H],[H,H],[1,H]
    # output
    out_ref,      # [TM, H+6] = [h_out | x_new | v_new | a_new]
):
    f32 = jnp.float32
    H = hst_ref.shape[-1]
    KH = hn_ref.shape[-1]
    K = KH // H

    hst = hst_ref[...]            # [TM, H]
    hn2 = hn_ref[...]             # [TM, KH]
    aux = aux_ref[...]            # [TM, 4K+6]

    dist_mask = aux[:, :2 * K]            # [TM, 2K]  (dist | mask)
    mask = aux[:, K:2 * K]                # [TM, K]
    rx = aux[:, 2 * K:3 * K]              # [TM, K]
    ry = aux[:, 3 * K:4 * K]              # [TM, K]
    ped = aux[:, 4 * K:4 * K + 6]         # [TM, 6]

    # dist_j * we1d (added to z1) and mask_j replicated over H lanes, in one matmul.
    dm = jnp.dot(dist_mask, w_dm_ref[...], preferred_element_type=f32)  # [TM, 2KH]
    dist_term = dm[:, :KH]
    mask_rep = dm[:, KH:]

    # ---- f_e over all K neighbors at once (block-diag weights keep blocks separate)
    z1 = (jnp.dot(hst, we1h_t_ref[...], preferred_element_type=f32)
          + jnp.dot(hn2, we1n_bd_ref[...], preferred_element_type=f32)
          + dist_term + be1_t_ref[...])                                  # [TM, KH]
    m = _silu(jnp.dot(_silu(z1), we2_bd_ref[...], preferred_element_type=f32)
              + be2_t_ref[...])                                          # [TM, KH]
    m = m * mask_rep                       # m_ij[~neigh_mask] = 0 (matches torch)

    # ---- f_x -> per-neighbor scalar fx, then masked coordinate aggregation
    x1 = _silu(jnp.dot(m, wx1_bd_ref[...], preferred_element_type=f32) + bx1_t_ref[...])
    fx = jnp.dot(x1, wx2_b_ref[...], preferred_element_type=f32) + bx2_ref[...]   # [TM, K]

    neigh_num = jnp.sum(mask, axis=-1, keepdims=True)                    # [TM, 1]
    inv_n = 1.0 / (neigh_num + 1e-6)       # exact divide: keep 1e-4 match with reference
    agg_x = jnp.sum(rx * fx, axis=-1, keepdims=True) * inv_n
    agg_y = jnp.sum(ry * fx, axis=-1, keepdims=True) * inv_n
    agg = jnp.concatenate([agg_x, agg_y], axis=-1)                       # [TM, 2]

    # ---- f_a  (width-1 projection done as VPU multiply + lane reduce, not MXU)
    a1 = _silu(jnp.dot(hst, wa1_ref[...], preferred_element_type=f32) + ba1_ref[...])
    fa = jnp.sum(a1 * wa2t_ref[...], axis=-1, keepdims=True) + ba2_ref[...]        # [TM, 1]

    a_new = fa * ped[:, 4:6] + agg
    v_new = ped[:, 2:4] + a_new
    x_new = ped[:, 0:2] + v_new

    # ---- f_h  (sum_j m_ij @ wh1m folded into one contraction-KH matmul)
    zh = (jnp.dot(hst, wh1h_ref[...], preferred_element_type=f32)
          + jnp.dot(m, wh1m_t_ref[...], preferred_element_type=f32)
          + bh1_ref[...])
    h_out = hst + jnp.dot(_silu(zh), wh2_ref[...], preferred_element_type=f32) + bh2_ref[...]

    out_ref[:, :H] = h_out
    out_ref[:, H:H + 2] = x_new
    out_ref[:, H + 2:H + 4] = v_new
    out_ref[:, H + 4:H + 6] = a_new


def pack_params(params, K):
    """One-time wrapper-side transform of torch-layout Linear weights into the
    lane-dense / block-diagonal forms consumed by the kernel."""
    (we1, be1, we2, be2, wx1, bx1, wx2, bx2,
     wa1, ba1, wa2, ba2, wh1, bh1, wh2, bh2) = [jnp.asarray(p, jnp.float32) for p in params]
    H = wa1.shape[0]
    KH = K * H

    we1h, we1n, we1d = we1[:H], we1[H:2 * H], we1[2 * H:]   # [H,H],[H,H],[1,H]
    wh1h, wh1m = wh1[:H], wh1[H:]                           # [H,H],[H,H]

    eye_k = jnp.eye(K, dtype=jnp.float32)
    bd = lambda w: jnp.kron(eye_k, w)                       # block-diagonal over neighbors

    we1h_t = jnp.tile(we1h, (1, K))                         # [H, KH]
    we1n_bd = bd(we1n)                                      # [KH, KH]
    wd = jnp.kron(eye_k, we1d)                              # [K, KH]  dist_j -> dist_j*we1d
    e_ind = jnp.kron(eye_k, jnp.ones((1, H), jnp.float32))  # [K, KH]  mask replication
    w_dm = jnp.zeros((2 * K, 2 * KH), jnp.float32)
    w_dm = w_dm.at[:K, :KH].set(wd).at[K:, KH:].set(e_ind)  # [2K, 2KH]

    be1_t = jnp.tile(be1, (1, K))
    we2_bd = bd(we2)
    be2_t = jnp.tile(be2, (1, K))
    wx1_bd = bd(wx1)
    bx1_t = jnp.tile(bx1, (1, K))
    wx2_b = jnp.kron(eye_k, wx2)                            # [KH, K]
    wh1m_t = jnp.tile(wh1m, (K, 1))                         # [KH, H]
    wa2t = wa2.T                                            # [1, H]

    return (we1h_t, we1n_bd, w_dm, be1_t, we2_bd, be2_t,
            wx1_bd, bx1_t, wx2_b, bx2,
            wa1, ba1, wa2t, ba2,
            wh1h, wh1m_t, bh1, wh2, bh2)


def conv_egnn3(ped, hst, hn, rela, mask, params, tm_max=1024):
    """ped:[bs,N,6] hst:[bs,N,H] hn:[bs,N,k,H] rela:[bs,N,k,6] mask:[bs,N,k]."""
    bs, N, _ = ped.shape
    k = hn.shape[2]
    H = hst.shape[-1]
    KH = k * H
    M = bs * N

    ped_f = ped.reshape(M, 6).astype(jnp.float32)
    hst_f = hst.reshape(M, H).astype(jnp.float32)
    hn_f = hn.reshape(M, KH).astype(jnp.float32)                 # lane-dense [M, k*H]
    rela2 = rela[..., :2].reshape(M, k, 2).astype(jnp.float32)   # only first 2 cols shipped
    mask_f = mask.reshape(M, k).astype(jnp.float32)

    dist = jnp.sqrt(jnp.sum(rela2 * rela2, axis=-1))             # [M, k] (computed once here)
    aux = jnp.concatenate(
        [dist, mask_f, rela2[..., 0], rela2[..., 1], ped_f], axis=-1)   # [M, 4k+6]
    AW = aux.shape[-1]

    # Row tile: as large as reasonable (up to tm_max), never padding more than needed.
    # Per-row VMEM footprint is ~1.7 KB, so even tm=1024 double-buffered is well under
    # the 32 MiB scoped default on v5e/v6e/v7x.  For realistic M this gives >=2 grid
    # steps so v7x's second TensorCore is used via the "parallel" axis.
    tm = min(_round_up(tm_max, 8), _round_up(M, 8))
    Mp = _round_up(M, tm)
    if Mp != M:
        pad = Mp - M
        hst_f = jnp.pad(hst_f, ((0, pad), (0, 0)))
        hn_f = jnp.pad(hn_f, ((0, pad), (0, 0)))
        aux = jnp.pad(aux, ((0, pad), (0, 0)))   # zero rows are numerically safe (agg=0)

    kparams = pack_params(params, k)

    data_specs = [
        pl.BlockSpec((tm, H), lambda i: (i, 0)),
        pl.BlockSpec((tm, KH), lambda i: (i, 0)),
        pl.BlockSpec((tm, AW), lambda i: (i, 0)),
    ]
    w_specs = [pl.BlockSpec(p.shape, lambda i: (0, 0)) for p in kparams]

    out = pl.pallas_call(
        egnn_kernel,
        out_shape=jax.ShapeDtypeStruct((Mp, H + 6), jnp.float32),
        grid=(Mp // tm,),
        in_specs=data_specs + w_specs,
        out_specs=pl.BlockSpec((tm, H + 6), lambda i: (i, 0)),
        compiler_params=pltpu.CompilerParams(dimension_semantics=("parallel",)),
    )(hst_f, hn_f, aux, *kparams)

    out = out[:M]
    hout = out[:, :H].reshape(bs, N, H)
    out6 = out[:, H:].reshape(bs, N, 6)
    return out6, hout


def init_params(key, H):
    """Deterministic init, PyTorch nn.Linear-style uniform bounds (in_dim == hid_dim == H)."""
    ks = iter(jax.random.split(key, 16))

    def lin(fan_in, fan_out):
        kw, kb = next(ks), next(ks)
        bound = 1.0 / np.sqrt(fan_in)
        w = jax.random.uniform(kw, (fan_in, fan_out), jnp.float32, -bound, bound)
        b = jax.random.uniform(kb, (1, fan_out), jnp.float32, -bound, bound)
        return w, b

    we1, be1 = lin(2 * H + 1, H)   # f_e[0]
    we2, be2 = lin(H, H)           # f_e[2]
    wx1, bx1 = lin(H, H)           # f_x[0]
    wx2, bx2 = lin(H, 1)           # f_x[2]
    wa1, ba1 = lin(H, H)           # f_a[0]
    wa2, ba2 = lin(H, 1)           # f_a[2]
    wh1, bh1 = lin(2 * H, H)       # f_h[0]
    wh2, bh2 = lin(H, H)           # f_h[2]
    return (we1, be1, we2, be2, wx1, bx1, wx2, bx2,
            wa1, ba1, wa2, ba2, wh1, bh1, wh2, bh2)


def reference(ped, hst, hn, rela, mask, params):
    """Pure-JAX reference mirroring the PyTorch forward exactly."""
    (we1, be1, we2, be2, wx1, bx1, wx2, bx2,
     wa1, ba1, wa2, ba2, wh1, bh1, wh2, bh2) = params
    silu = lambda x: x * jax.nn.sigmoid(x)

    dists = jnp.sqrt(jnp.sum(rela[..., :2] ** 2, axis=-1))
    neigh_num = mask.sum(-1)
    tmp = jnp.concatenate(
        [jnp.broadcast_to(hst[..., None, :], hn.shape), hn, dists[..., None]], axis=-1)
    m_ij = silu(silu(tmp @ we1 + be1) @ we2 + be2)
    m_ij = m_ij * mask[..., None]
    fx = silu(m_ij @ wx1 + bx1) @ wx2 + bx2
    agg = (rela[..., :2] * fx).sum(-2) / (neigh_num[..., None] + 1e-6)
    fa = silu(hst @ wa1 + ba1) @ wa2 + ba2
    a_new = fa * ped[..., 4:] + agg
    v_new = ped[..., 2:4] + a_new
    x_new = ped[..., :2] + v_new
    m_i = m_ij.sum(-2)
    h_new = hst + (silu(jnp.concatenate([hst, m_i], -1) @ wh1 + bh1) @ wh2 + bh2)
    return jnp.concatenate([x_new, v_new, a_new], -1), h_new


if __name__ == "__main__":
    key = jax.random.PRNGKey(0)
    bs, N, k, H = 2, 8, 4, 32   # in_dim == hid_dim == H (required by f_e's input size)
    k1, k2, k3, k4, k5, kp = jax.random.split(key, 6)

    ped = jax.random.normal(k1, (bs, N, 6), jnp.float32)
    hst = jax.random.normal(k2, (bs, N, H), jnp.float32)
    hn = jax.random.normal(k3, (bs, N, k, H), jnp.float32)
    rela = jax.random.normal(k4, (bs, N, k, 6), jnp.float32)
    mask = (jax.random.uniform(k5, (bs, N, k)) > 0.3).astype(jnp.float32)
    params = init_params(kp, H)

    out6, hout = conv_egnn3(ped, hst, hn, rela, mask, params)
    jax.block_until_ready((out6, hout))

    ref6, refh = reference(ped, hst, hn, rela, mask, params)
    assert np.allclose(np.asarray(out6), np.asarray(ref6), atol=1e-4, rtol=1e-4)
    assert np.allclose(np.asarray(hout), np.asarray(refh), atol=1e-4, rtol=1e-4)

    print("KERNEL_OK")
</pallas_src>

<mosaic_0001>
module attributes {stable_mosaic.version = 11 : i64} {
  func.func @egnn_kernel(%arg0: i32, %arg1: memref<16x32xf32, #tpu.memory_space<vmem>>, %arg2: memref<16x128xf32, #tpu.memory_space<vmem>>, %arg3: memref<16x22xf32, #tpu.memory_space<vmem>>, %arg4: memref<32x128xf32, #tpu.memory_space<vmem>>, %arg5: memref<128x128xf32, #tpu.memory_space<vmem>>, %arg6: memref<8x256xf32, #tpu.memory_space<vmem>>, %arg7: memref<1x128xf32, #tpu.memory_space<vmem>>, %arg8: memref<128x128xf32, #tpu.memory_space<vmem>>, %arg9: memref<1x128xf32, #tpu.memory_space<vmem>>, %arg10: memref<128x128xf32, #tpu.memory_space<vmem>>, %arg11: memref<1x128xf32, #tpu.memory_space<vmem>>, %arg12: memref<128x4xf32, #tpu.memory_space<vmem>>, %arg13: memref<1x1xf32, #tpu.memory_space<vmem>>, %arg14: memref<32x32xf32, #tpu.memory_space<vmem>>, %arg15: memref<1x32xf32, #tpu.memory_space<vmem>>, %arg16: memref<1x32xf32, #tpu.memory_space<vmem>>, %arg17: memref<1x1xf32, #tpu.memory_space<vmem>>, %arg18: memref<32x32xf32, #tpu.memory_space<vmem>>, %arg19: memref<128x32xf32, #tpu.memory_space<vmem>>, %arg20: memref<1x32xf32, #tpu.memory_space<vmem>>, %arg21: memref<32x32xf32, #tpu.memory_space<vmem>>, %arg22: memref<1x32xf32, #tpu.memory_space<vmem>>, %arg23: memref<16x38xf32, #tpu.memory_space<vmem>>) attributes {dimension_semantics = [#tpu.dimension_semantics<parallel>], iteration_bounds = array<i64: 1>, scalar_prefetch = 0 : i64, scratch_operands = 0 : i64, tpu.core_type = #tpu.core_type<tc>, window_params = [{transform_indices = @transform_0, window_bounds = array<i64: 16, 32>}, {transform_indices = @transform_1, window_bounds = array<i64: 16, 128>}, {transform_indices = @transform_2, window_bounds = array<i64: 16, 22>}, {pipeline_mode = #tpu.pipeline_mode<synchronous>, transform_indices = @transform_3, window_bounds = array<i64: 32, 128>}, {pipeline_mode = #tpu.pipeline_mode<synchronous>, transform_indices = @transform_4, window_bounds = array<i64: 128, 128>}, {pipeline_mode = #tpu.pipeline_mode<synchronous>, transform_indices = @transform_5, window_bounds = array<i64: 8, 256>}, {pipeline_mode = #tpu.pipeline_mode<synchronous>, transform_indices = @transform_6, window_bounds = array<i64: 1, 128>}, {pipeline_mode = #tpu.pipeline_mode<synchronous>, transform_indices = @transform_7, window_bounds = array<i64: 128, 128>}, {pipeline_mode = #tpu.pipeline_mode<synchronous>, transform_indices = @transform_8, window_bounds = array<i64: 1, 128>}, {pipeline_mode = #tpu.pipeline_mode<synchronous>, transform_indices = @transform_9, window_bounds = array<i64: 128, 128>}, {pipeline_mode = #tpu.pipeline_mode<synchronous>, transform_indices = @transform_10, window_bounds = array<i64: 1, 128>}, {pipeline_mode = #tpu.pipeline_mode<synchronous>, transform_indices = @transform_11, window_bounds = array<i64: 128, 4>}, {pipeline_mode = #tpu.pipeline_mode<synchronous>, transform_indices = @transform_12, window_bounds = array<i64: 1, 1>}, {pipeline_mode = #tpu.pipeline_mode<synchronous>, transform_indices = @transform_13, window_bounds = array<i64: 32, 32>}, {pipeline_mode = #tpu.pipeline_mode<synchronous>, transform_indices = @transform_14, window_bounds = array<i64: 1, 32>}, {pipeline_mode = #tpu.pipeline_mode<synchronous>, transform_indices = @transform_15, window_bounds = array<i64: 1, 32>}, {pipeline_mode = #tpu.pipeline_mode<synchronous>, transform_indices = @transform_16, window_bounds = array<i64: 1, 1>}, {pipeline_mode = #tpu.pipeline_mode<synchronous>, transform_indices = @transform_17, window_bounds = array<i64: 32, 32>}, {pipeline_mode = #tpu.pipeline_mode<synchronous>, transform_indices = @transform_18, window_bounds = array<i64: 128, 32>}, {pipeline_mode = #tpu.pipeline_mode<synchronous>, transform_indices = @transform_19, window_bounds = array<i64: 1, 32>}, {pipeline_mode = #tpu.pipeline_mode<synchronous>, transform_indices = @transform_20, window_bounds = array<i64: 32, 32>}, {pipeline_mode = #tpu.pipeline_mode<synchronous>, transform_indices = @transform_21, window_bounds = array<i64: 1, 32>}, {transform_indices = @transform_22, window_bounds = array<i64: 16, 38>}]} {
    %c0 = arith.constant 0 : index
    %c0_0 = arith.constant 0 : index
    %0 = vector.load %arg1[%c0, %c0_0] : memref<16x32xf32, #tpu.memory_space<vmem>>, vector<16x32xf32>
    %c0_1 = arith.constant 0 : index
    %c0_2 = arith.constant 0 : index
    %1 = vector.load %arg2[%c0_1, %c0_2] : memref<16x128xf32, #tpu.memory_space<vmem>>, vector<16x128xf32>
    %c0_3 = arith.constant 0 : index
    %c0_4 = arith.constant 0 : index
    %2 = vector.load %arg3[%c0_3, %c0_4] : memref<16x22xf32, #tpu.memory_space<vmem>>, vector<16x22xf32>
    %3 = vector.extract_strided_slice %2 {offsets = [0, 0], sizes = [16, 8], strides = [1, 1]} : vector<16x22xf32> to vector<16x8xf32>
    %4 = vector.extract_strided_slice %2 {offsets = [0, 4], sizes = [16, 4], strides = [1, 1]} : vector<16x22xf32> to vector<16x4xf32>
    %5 = vector.extract_strided_slice %2 {offsets = [0, 8], sizes = [16, 4], strides = [1, 1]} : vector<16x22xf32> to vector<16x4xf32>
    %6 = vector.extract_strided_slice %2 {offsets = [0, 12], sizes = [16, 4], strides = [1, 1]} : vector<16x22xf32> to vector<16x4xf32>
    %7 = vector.extract_strided_slice %2 {offsets = [0, 16], sizes = [16, 6], strides = [1, 1]} : vector<16x22xf32> to vector<16x6xf32>
    %c0_5 = arith.constant 0 : index
    %c0_6 = arith.constant 0 : index
    %8 = vector.load %arg6[%c0_5, %c0_6] : memref<8x256xf32, #tpu.memory_space<vmem>>, vector<8x256xf32>
    %cst = arith.constant dense<0.000000e+00> : vector<16x256xf32>
    %9 = tpu.matmul %3, %8, %cst {dimension_numbers = #tpu.dot_dimension_numbers<[1], [0], [0], [1], [0, 0, 1, 1], [], []>} : vector<16x8xf32>, vector<8x256xf32>, vector<16x256xf32> -> vector<16x256xf32>
    %10 = vector.extract_strided_slice %9 {offsets = [0, 0], sizes = [16, 128], strides = [1, 1]} : vector<16x256xf32> to vector<16x128xf32>
    %11 = vector.extract_strided_slice %9 {offsets = [0, 128], sizes = [16, 128], strides = [1, 1]} : vector<16x256xf32> to vector<16x128xf32>
    %c0_7 = arith.constant 0 : index
    %c0_8 = arith.constant 0 : index
    %12 = vector.load %arg4[%c0_7, %c0_8] : memref<32x128xf32, #tpu.memory_space<vmem>>, vector<32x128xf32>
    %cst_9 = arith.constant dense<0.000000e+00> : vector<16x128xf32>
    %13 = tpu.matmul %0, %12, %cst_9 {dimension_numbers = #tpu.dot_dimension_numbers<[1], [0], [0], [1], [0, 0, 1, 1], [], []>} : vector<16x32xf32>, vector<32x128xf32>, vector<16x128xf32> -> vector<16x128xf32>
    %c0_10 = arith.constant 0 : index
    %c0_11 = arith.constant 0 : index
    %14 = vector.load %arg5[%c0_10, %c0_11] : memref<128x128xf32, #tpu.memory_space<vmem>>, vector<128x128xf32>
    %cst_12 = arith.constant dense<0.000000e+00> : vector<16x128xf32>
    %15 = tpu.matmul %1, %14, %cst_12 {dimension_numbers = #tpu.dot_dimension_numbers<[1], [0], [0], [1], [0, 0, 1, 1], [], []>} : vector<16x128xf32>, vector<128x128xf32>, vector<16x128xf32> -> vector<16x128xf32>
    %16 = arith.addf %13, %15 : vector<16x128xf32>
    %17 = arith.addf %16, %10 : vector<16x128xf32>
    %c0_13 = arith.constant 0 : index
    %c0_14 = arith.constant 0 : index
    %18 = vector.load %arg7[%c0_13, %c0_14] : memref<1x128xf32, #tpu.memory_space<vmem>>, vector<1x128xf32>
    %19 = vector.broadcast %18 : vector<1x128xf32> to vector<16x128xf32>
    %20 = arith.addf %17, %19 : vector<16x128xf32>
    %21 = arith.negf %20 : vector<16x128xf32>
    %22 = math.exp %21 : vector<16x128xf32>
    %cst_15 = arith.constant 1.000000e+00 : f32
    %23 = vector.broadcast %cst_15 : f32 to vector<16x128xf32>
    %24 = arith.addf %23, %22 : vector<16x128xf32>
    %25 = arith.divf %23, %24 : vector<16x128xf32>
    %26 = arith.mulf %20, %25 : vector<16x128xf32>
    %c0_16 = arith.constant 0 : index
    %c0_17 = arith.constant 0 : index
    %27 = vector.load %arg8[%c0_16, %c0_17] : memref<128x128xf32, #tpu.memory_space<vmem>>, vector<128x128xf32>
    %cst_18 = arith.constant dense<0.000000e+00> : vector<16x128xf32>
    %28 = tpu.matmul %26, %27, %cst_18 {dimension_numbers = #tpu.dot_dimension_numbers<[1], [0], [0], [1], [0, 0, 1, 1], [], []>} : vector<16x128xf32>, vector<128x128xf32>, vector<16x128xf32> -> vector<16x128xf32>
    %c0_19 = arith.constant 0 : index
    %c0_20 = arith.constant 0 : index
    %29 = vector.load %arg9[%c0_19, %c0_20] : memref<1x128xf32, #tpu.memory_space<vmem>>, vector<1x128xf32>
    %30 = vector.broadcast %29 : vector<1x128xf32> to vector<16x128xf32>
    %31 = arith.addf %28, %30 : vector<16x128xf32>
    %32 = arith.negf %31 : vector<16x128xf32>
    %33 = math.exp %32 : vector<16x128xf32>
    %cst_21 = arith.constant 1.000000e+00 : f32
    %34 = vector.broadcast %cst_21 : f32 to vector<16x128xf32>
    %35 = arith.addf %34, %33 : vector<16x128xf32>
    %36 = arith.divf %34, %35 : vector<16x128xf32>
    %37 = arith.mulf %31, %36 : vector<16x128xf32>
    %38 = arith.mulf %37, %11 : vector<16x128xf32>
    %c0_22 = arith.constant 0 : index
    %c0_23 = arith.constant 0 : index
    %39 = vector.load %arg10[%c0_22, %c0_23] : memref<128x128xf32, #tpu.memory_space<vmem>>, vector<128x128xf32>
    %cst_24 = arith.constant dense<0.000000e+00> : vector<16x128xf32>
    %40 = tpu.matmul %38, %39, %cst_24 {dimension_numbers = #tpu.dot_dimension_numbers<[1], [0], [0], [1], [0, 0, 1, 1], [], []>} : vector<16x128xf32>, vector<128x128xf32>, vector<16x128xf32> -> vector<16x128xf32>
    %c0_25 = arith.constant 0 : index
    %c0_26 = arith.constant 0 : index
    %41 = vector.load %arg11[%c0_25, %c0_26] : memref<1x128xf32, #tpu.memory_space<vmem>>, vector<1x128xf32>
    %42 = vector.broadcast %41 : vector<1x128xf32> to vector<16x128xf32>
    %43 = arith.addf %40, %42 : vector<16x128xf32>
    %44 = arith.negf %43 : vector<16x128xf32>
    %45 = math.exp %44 : vector<16x128xf32>
    %cst_27 = arith.constant 1.000000e+00 : f32
    %46 = vector.broadcast %cst_27 : f32 to vector<16x128xf32>
    %47 = arith.addf %46, %45 : vector<16x128xf32>
    %48 = arith.divf %46, %47 : vector<16x128xf32>
    %49 = arith.mulf %43, %48 : vector<16x128xf32>
    %c0_28 = arith.constant 0 : index
    %c0_29 = arith.constant 0 : index
    %50 = vector.load %arg12[%c0_28, %c0_29] : memref<128x4xf32, #tpu.memory_space<vmem>>, vector<128x4xf32>
    %cst_30 = arith.constant dense<0.000000e+00> : vector<16x4xf32>
    %51 = tpu.matmul %49, %50, %cst_30 {dimension_numbers = #tpu.dot_dimension_numbers<[1], [0], [0], [1], [0, 0, 1, 1], [], []>} : vector<16x128xf32>, vector<128x4xf32>, vector<16x4xf32> -> vector<16x4xf32>
    %c0_31 = arith.constant 0 : index
    %c0_32 = arith.constant 0 : index
    %52 = vector.load %arg13[%c0_31, %c0_32] : memref<1x1xf32, #tpu.memory_space<vmem>>, vector<1x1xf32>
    %53 = vector.broadcast %52 : vector<1x1xf32> to vector<16x4xf32>
    %54 = arith.addf %51, %53 : vector<16x4xf32>
    %cst_33 = arith.constant dense<0.000000e+00> : vector<16xf32>
    %55 = vector.multi_reduction <add>, %4, %cst_33 [1] : vector<16x4xf32> to vector<16xf32>
    %56 = vector.shape_cast %55 : vector<16xf32> to vector<16x1xf32>
    %cst_34 = arith.constant 9.99999997E-7 : f32
    %57 = vector.broadcast %cst_34 : f32 to vector<16x1xf32>
    %58 = arith.addf %56, %57 : vector<16x1xf32>
    %cst_35 = arith.constant 1.000000e+00 : f32
    %59 = vector.broadcast %cst_35 : f32 to vector<16x1xf32>
    %60 = arith.divf %59, %58 : vector<16x1xf32>
    %61 = arith.mulf %5, %54 : vector<16x4xf32>
    %cst_36 = arith.constant dense<0.000000e+00> : vector<16xf32>
    %62 = vector.multi_reduction <add>, %61, %cst_36 [1] : vector<16x4xf32> to vector<16xf32>
    %63 = vector.shape_cast %62 : vector<16xf32> to vector<16x1xf32>
    %64 = arith.mulf %63, %60 : vector<16x1xf32>
    %65 = arith.mulf %6, %54 : vector<16x4xf32>
    %cst_37 = arith.constant dense<0.000000e+00> : vector<16xf32>
    %66 = vector.multi_reduction <add>, %65, %cst_37 [1] : vector<16x4xf32> to vector<16xf32>
    %67 = vector.shape_cast %66 : vector<16xf32> to vector<16x1xf32>
    %68 = arith.mulf %67, %60 : vector<16x1xf32>
    %69 = tpu.concatenate %64, %68 in 1 : vector<16x1xf32>, vector<16x1xf32> -> vector<16x2xf32>
    %c0_38 = arith.constant 0 : index
    %c0_39 = arith.constant 0 : index
    %70 = vector.load %arg14[%c0_38, %c0_39] : memref<32x32xf32, #tpu.memory_space<vmem>>, vector<32x32xf32>
    %cst_40 = arith.constant dense<0.000000e+00> : vector<16x32xf32>
    %71 = tpu.matmul %0, %70, %cst_40 {dimension_numbers = #tpu.dot_dimension_numbers<[1], [0], [0], [1], [0, 0, 1, 1], [], []>} : vector<16x32xf32>, vector<32x32xf32>, vector<16x32xf32> -> vector<16x32xf32>
    %c0_41 = arith.constant 0 : index
    %c0_42 = arith.constant 0 : index
    %72 = vector.load %arg15[%c0_41, %c0_42] : memref<1x32xf32, #tpu.memory_space<vmem>>, vector<1x32xf32>
    %73 = vector.broadcast %72 : vector<1x32xf32> to vector<16x32xf32>
    %74 = arith.addf %71, %73 : vector<16x32xf32>
    %75 = arith.negf %74 : vector<16x32xf32>
    %76 = math.exp %75 : vector<16x32xf32>
    %cst_43 = arith.constant 1.000000e+00 : f32
    %77 = vector.broadcast %cst_43 : f32 to vector<16x32xf32>
    %78 = arith.addf %77, %76 : vector<16x32xf32>
    %79 = arith.divf %77, %78 : vector<16x32xf32>
    %80 = arith.mulf %74, %79 : vector<16x32xf32>
    %c0_44 = arith.constant 0 : index
    %c0_45 = arith.constant 0 : index
    %81 = vector.load %arg16[%c0_44, %c0_45] : memref<1x32xf32, #tpu.memory_space<vmem>>, vector<1x32xf32>
    %82 = vector.broadcast %81 : vector<1x32xf32> to vector<16x32xf32>
    %83 = arith.mulf %80, %82 : vector<16x32xf32>
    %cst_46 = arith.constant dense<0.000000e+00> : vector<16xf32>
    %84 = vector.multi_reduction <add>, %83, %cst_46 [1] : vector<16x32xf32> to vector<16xf32>
    %85 = vector.shape_cast %84 : vector<16xf32> to vector<16x1xf32>
    %c0_47 = arith.constant 0 : index
    %c0_48 = arith.constant 0 : index
    %86 = vector.load %arg17[%c0_47, %c0_48] : memref<1x1xf32, #tpu.memory_space<vmem>>, vector<1x1xf32>
    %87 = vector.broadcast %86 : vector<1x1xf32> to vector<16x1xf32>
    %88 = arith.addf %85, %87 : vector<16x1xf32>
    %89 = vector.extract_strided_slice %7 {offsets = [0, 4], sizes = [16, 2], strides = [1, 1]} : vector<16x6xf32> to vector<16x2xf32>
    %90 = vector.broadcast %88 : vector<16x1xf32> to vector<16x2xf32>
    %91 = arith.mulf %90, %89 : vector<16x2xf32>
    %92 = arith.addf %91, %69 : vector<16x2xf32>
    %93 = vector.extract_strided_slice %7 {offsets = [0, 2], sizes = [16, 2], strides = [1, 1]} : vector<16x6xf32> to vector<16x2xf32>
    %94 = arith.addf %93, %92 : vector<16x2xf32>
    %95 = vector.extract_strided_slice %7 {offsets = [0, 0], sizes = [16, 2], strides = [1, 1]} : vector<16x6xf32> to vector<16x2xf32>
    %96 = arith.addf %95, %94 : vector<16x2xf32>
    %c0_49 = arith.constant 0 : index
    %c0_50 = arith.constant 0 : index
    %97 = vector.load %arg18[%c0_49, %c0_50] : memref<32x32xf32, #tpu.memory_space<vmem>>, vector<32x32xf32>
    %cst_51 = arith.constant dense<0.000000e+00> : vector<16x32xf32>
    %98 = tpu.matmul %0, %97, %cst_51 {dimension_numbers = #tpu.dot_dimension_numbers<[1], [0], [0], [1], [0, 0, 1, 1], [], []>} : vector<16x32xf32>, vector<32x32xf32>, vector<16x32xf32> -> vector<16x32xf32>
    %c0_52 = arith.constant 0 : index
    %c0_53 = arith.constant 0 : index
    %99 = vector.load %arg19[%c0_52, %c0_53] : memref<128x32xf32, #tpu.memory_space<vmem>>, vector<128x32xf32>
    %cst_54 = arith.constant dense<0.000000e+00> : vector<16x32xf32>
    %100 = tpu.matmul %38, %99, %cst_54 {dimension_numbers = #tpu.dot_dimension_numbers<[1], [0], [0], [1], [0, 0, 1, 1], [], []>} : vector<16x128xf32>, vector<128x32xf32>, vector<16x32xf32> -> vector<16x32xf32>
    %101 = arith.addf %98, %100 : vector<16x32xf32>
    %c0_55 = arith.constant 0 : index
    %c0_56 = arith.constant 0 : index
    %102 = vector.load %arg20[%c0_55, %c0_56] : memref<1x32xf32, #tpu.memory_space<vmem>>, vector<1x32xf32>
    %103 = vector.broadcast %102 : vector<1x32xf32> to vector<16x32xf32>
    %104 = arith.addf %101, %103 : vector<16x32xf32>
    %105 = arith.negf %104 : vector<16x32xf32>
    %106 = math.exp %105 : vector<16x32xf32>
    %cst_57 = arith.constant 1.000000e+00 : f32
    %107 = vector.broadcast %cst_57 : f32 to vector<16x32xf32>
    %108 = arith.addf %107, %106 : vector<16x32xf32>
    %109 = arith.divf %107, %108 : vector<16x32xf32>
    %110 = arith.mulf %104, %109 : vector<16x32xf32>
    %c0_58 = arith.constant 0 : index
    %c0_59 = arith.constant 0 : index
    %111 = vector.load %arg21[%c0_58, %c0_59] : memref<32x32xf32, #tpu.memory_space<vmem>>, vector<32x32xf32>
    %cst_60 = arith.constant dense<0.000000e+00> : vector<16x32xf32>
    %112 = tpu.matmul %110, %111, %cst_60 {dimension_numbers = #tpu.dot_dimension_numbers<[1], [0], [0], [1], [0, 0, 1, 1], [], []>} : vector<16x32xf32>, vector<32x32xf32>, vector<16x32xf32> -> vector<16x32xf32>
    %113 = arith.addf %0, %112 : vector<16x32xf32>
    %c0_61 = arith.constant 0 : index
    %c0_62 = arith.constant 0 : index
    %114 = vector.load %arg22[%c0_61, %c0_62] : memref<1x32xf32, #tpu.memory_space<vmem>>, vector<1x32xf32>
    %115 = vector.broadcast %114 : vector<1x32xf32> to vector<16x32xf32>
    %116 = arith.addf %113, %115 : vector<16x32xf32>
    %c0_63 = arith.constant 0 : index
    %c0_64 = arith.constant 0 : index
    %117 = vector.load %arg23[%c0_63, %c0_64] : memref<16x38xf32, #tpu.memory_space<vmem>>, vector<16x32xf32>
    tpu.vector_store %arg23[%c0_63, %c0_64], %116 {strides = array<i32>} : memref<16x38xf32, #tpu.memory_space<vmem>>, vector<16x32xf32>,
    %c0_65 = arith.constant 0 : index
    %c32 = arith.constant 32 : index
    %118 = vector.load %arg23[%c0_65, %c32] : memref<16x38xf32, #tpu.memory_space<vmem>>, vector<16x2xf32>
    tpu.vector_store %arg23[%c0_65, %c32], %96 {strides = array<i32>} : memref<16x38xf32, #tpu.memory_space<vmem>>, vector<16x2xf32>,
    %c0_66 = arith.constant 0 : index
    %c34 = arith.constant 34 : index
    %119 = vector.load %arg23[%c0_66, %c34] : memref<16x38xf32, #tpu.memory_space<vmem>>, vector<16x2xf32>
    tpu.vector_store %arg23[%c0_66, %c34], %94 {strides = array<i32>} : memref<16x38xf32, #tpu.memory_space<vmem>>, vector<16x2xf32>,
    %c0_67 = arith.constant 0 : index
    %c36 = arith.constant 36 : index
    %120 = vector.load %arg23[%c0_67, %c36] : memref<16x38xf32, #tpu.memory_space<vmem>>, vector<16x2xf32>
    tpu.vector_store %arg23[%c0_67, %c36], %92 {strides = array<i32>} : memref<16x38xf32, #tpu.memory_space<vmem>>, vector<16x2xf32>,
    return
  }
  func.func @transform_0(%arg0: i32) -> (i32, i32) {
    %c0_i32 = arith.constant 0 : i32
    %c0_i32_0 = arith.constant 0 : i32
    return %arg0, %c0_i32 : i32, i32
  }
  func.func @transform_1(%arg0: i32) -> (i32, i32) {
    %c0_i32 = arith.constant 0 : i32
    %c0_i32_0 = arith.constant 0 : i32
    return %arg0, %c0_i32 : i32, i32
  }
  func.func @transform_2(%arg0: i32) -> (i32, i32) {
    %c0_i32 = arith.constant 0 : i32
    %c0_i32_0 = arith.constant 0 : i32
    return %arg0, %c0_i32 : i32, i32
  }
  func.func @transform_3(%arg0: i32) -> (i32, i32) {
    %c0_i32 = arith.constant 0 : i32
    %c0_i32_0 = arith.constant 0 : i32
    %c0_i32_1 = arith.constant 0 : i32
    return %c0_i32, %c0_i32_0 : i32, i32
  }
  func.func @transform_4(%arg0: i32) -> (i32, i32) {
    %c0_i32 = arith.constant 0 : i32
    %c0_i32_0 = arith.constant 0 : i32
    %c0_i32_1 = arith.constant 0 : i32
    return %c0_i32, %c0_i32_0 : i32, i32
  }
  func.func @transform_5(%arg0: i32) -> (i32, i32) {
    %c0_i32 = arith.constant 0 : i32
    %c0_i32_0 = arith.constant 0 : i32
    %c0_i32_1 = arith.constant 0 : i32
    return %c0_i32, %c0_i32_0 : i32, i32
  }
  func.func @transform_6(%arg0: i32) -> (i32, i32) {
    %c0_i32 = arith.constant 0 : i32
    %c0_i32_0 = arith.constant 0 : i32
    %c0_i32_1 = arith.constant 0 : i32
    return %c0_i32, %c0_i32_0 : i32, i32
  }
  func.func @transform_7(%arg0: i32) -> (i32, i32) {
    %c0_i32 = arith.constant 0 : i32
    %c0_i32_0 = arith.constant 0 : i32
    %c0_i32_1 = arith.constant 0 : i32
    return %c0_i32, %c0_i32_0 : i32, i32
  }
  func.func @transform_8(%arg0: i32) -> (i32, i32) {
    %c0_i32 = arith.constant 0 : i32
    %c0_i32_0 = arith.constant 0 : i32
    %c0_i32_1 = arith.constant 0 : i32
    return %c0_i32, %c0_i32_0 : i32, i32
  }
  func.func @transform_9(%arg0: i32) -> (i32, i32) {
    %c0_i32 = arith.constant 0 : i32
    %c0_i32_0 = arith.constant 0 : i32
    %c0_i32_1 = arith.constant 0 : i32
    return %c0_i32, %c0_i32_0 : i32, i32
  }
  func.func @transform_10(%arg0: i32) -> (i32, i32) {
    %c0_i32 = arith.constant 0 : i32
    %c0_i32_0 = arith.constant 0 : i32
    %c0_i32_1 = arith.constant 0 : i32
    return %c0_i32, %c0_i32_0 : i32, i32
  }
  func.func @transform_11(%arg0: i32) -> (i32, i32) {
    %c0_i32 = arith.constant 0 : i32
    %c0_i32_0 = arith.constant 0 : i32
    %c0_i32_1 = arith.constant 0 : i32
    return %c0_i32, %c0_i32_0 : i32, i32
  }
  func.func @transform_12(%arg0: i32) -> (i32, i32) {
    %c0_i32 = arith.constant 0 : i32
    %c0_i32_0 = arith.constant 0 : i32
    %c0_i32_1 = arith.constant 0 : i32
    return %c0_i32, %c0_i32_0 : i32, i32
  }
  func.func @transform_13(%arg0: i32) -> (i32, i32) {
    %c0_i32 = arith.constant 0 : i32
    %c0_i32_0 = arith.constant 0 : i32
    %c0_i32_1 = arith.constant 0 : i32
    return %c0_i32, %c0_i32_0 : i32, i32
  }
  func.func @transform_14(%arg0: i32) -> (i32, i32) {
    %c0_i32 = arith.constant 0 : i32
    %c0_i32_0 = arith.constant 0 : i32
    %c0_i32_1 = arith.constant 0 : i32
    return %c0_i32, %c0_i32_0 : i32, i32
  }
  func.func @transform_15(%arg0: i32) -> (i32, i32) {
    %c0_i32 = arith.constant 0 : i32
    %c0_i32_0 = arith.constant 0 : i32
    %c0_i32_1 = arith.constant 0 : i32
    return %c0_i32, %c0_i32_0 : i32, i32
  }
  func.func @transform_16(%arg0: i32) -> (i32, i32) {
    %c0_i32 = arith.constant 0 : i32
    %c0_i32_0 = arith.constant 0 : i32
    %c0_i32_1 = arith.constant 0 : i32
    return %c0_i32, %c0_i32_0 : i32, i32
  }
  func.func @transform_17(%arg0: i32) -> (i32, i32) {
    %c0_i32 = arith.constant 0 : i32
    %c0_i32_0 = arith.constant 0 : i32
    %c0_i32_1 = arith.constant 0 : i32
    return %c0_i32, %c0_i32_0 : i32, i32
  }
  func.func @transform_18(%arg0: i32) -> (i32, i32) {
    %c0_i32 = arith.constant 0 : i32
    %c0_i32_0 = arith.constant 0 : i32
    %c0_i32_1 = arith.constant 0 : i32
    return %c0_i32, %c0_i32_0 : i32, i32
  }
  func.func @transform_19(%arg0: i32) -> (i32, i32) {
    %c0_i32 = arith.constant 0 : i32
    %c0_i32_0 = arith.constant 0 : i32
    %c0_i32_1 = arith.constant 0 : i32
    return %c0_i32, %c0_i32_0 : i32, i32
  }
  func.func @transform_20(%arg0: i32) -> (i32, i32) {
    %c0_i32 = arith.constant 0 : i32
    %c0_i32_0 = arith.constant 0 : i32
    %c0_i32_1 = arith.constant 0 : i32
    return %c0_i32, %c0_i32_0 : i32, i32
  }
  func.func @transform_21(%arg0: i32) -> (i32, i32) {
    %c0_i32 = arith.constant 0 : i32
    %c0_i32_0 = arith.constant 0 : i32
    %c0_i32_1 = arith.constant 0 : i32
    return %c0_i32, %c0_i32_0 : i32, i32
  }
  func.func @transform_22(%arg0: i32) -> (i32, i32) {
    %c0_i32 = arith.constant 0 : i32
    %c0_i32_0 = arith.constant 0 : i32
    return %arg0, %c0_i32 : i32, i32
  }
}

</mosaic_0001>

<bundles_post_ra>
// kernel: tpu_custom_call.1
= control target key start
LH: loop header
LB: loop body
LE: loop exit
PB: predicated region body
PF: predicated region fallthrough
CT: control target
= control target key end

     0   :  { %s2997_s0 = inlined_call_operand.hbm [shape: f32[16,32], index: 0, kind: input, shape index: {}]   ;;  %s2998_s1 = inlined_call_operand.hbm [shape: f32[16,128], index: 1, kind: input, shape index: {}]   ;;  %s2999_s2 = inlined_call_operand.hbm [shape: f32[16,22], index: 2, kind: input, shape index: {}]   ;;  %s3000_s3 = inlined_call_operand.hbm [shape: f32[32,128], index: 3, kind: input, shape index: {}]   ;;  %s3001_s4 = inlined_call_operand.vmem [shape: f32[128,128], index: 4, kind: input, shape index: {}]   ;;  %s3002_s5 = inlined_call_operand.hbm [shape: f32[8,256], index: 5, kind: input, shape index: {}]   ;;  %s3003_s6 = inlined_call_operand.hbm [shape: f32[1,128], index: 6, kind: input, shape index: {}]   ;;  %s3004_s7 = inlined_call_operand.vmem [shape: f32[128,128], index: 7, kind: input, shape index: {}]   ;;  %s3005_s8 = inlined_call_operand.hbm [shape: f32[1,128], index: 8, kind: input, shape index: {}]   ;;  %s3006_s9 = inlined_call_operand.hbm [shape: f32[128,128], index: 9, kind: input, shape index: {}]   ;;  %s3007_s10 = inlined_call_operand.hbm [shape: f32[1,128], index: 10, kind: input, shape index: {}]   ;;  %s3008_s11 = inlined_call_operand.vmem [shape: f32[128,4], index: 11, kind: input, shape index: {}]   ;;  %s3009_s12 = inlined_call_operand.<no memory space> [shape: f32[1,1], index: 12, kind: input, shape index: {}]   ;;  %s3010_s13 = inlined_call_operand.vmem [shape: f32[32,32], index: 13, kind: input, shape index: {}]   ;;  %s3011_s14 = inlined_call_operand.hbm [shape: f32[1,32], index: 14, kind: input, shape index: {}]   ;;  %s3012_s15 = inlined_call_operand.hbm [shape: f32[1,32], index: 15, kind: input, shape index: {}]   ;;  %s3013_s17 = inlined_call_operand.vmem [shape: f32[32,32], index: 17, kind: input, shape index: {}]   ;;  %s3014_s18 = inlined_call_operand.vmem [shape: f32[128,32], index: 18, kind: input, shape index: {}]   ;;  %s3015_s19 = inlined_call_operand.vmem [shape: f32[1,32], index: 19, kind: input, shape index: {}]   ;;  %s3016_s20 = inlined_call_operand.hbm [shape: f32[32,32], index: 20, kind: input, shape index: {}]   ;;  %s3017_s21 = inlined_call_operand.vmem [shape: f32[1,32], index: 21, kind: input, shape index: {}]   ;;  %s3018_s22 = inlined_call_operand.hbm [shape: f32[16,38], index: 22, kind: output, shape index: {}]   ;;  %s3019_s16 = inlined_call_operand.<no memory space> [shape: f32[1,1], index: 16, kind: input, shape index: {}]  }
   0x1   :  { %3028 = sst [smem:[#allocation33_spill]] %s2997_s0  ;;  %v27_v0 = vstv %s3009_s12  ;;  %v29_v1 = vstv %s3019_s16 }
   0x2   :  { %3029 = sst [smem:[#allocation34_spill]] %s2998_s1  ;;  %28 = vst [vmem:[#allocation2] sm:$0x1] %v27_v0  ;;  %30 = vst [vmem:[#allocation3] sm:$0x1] %v29_v1 }
   0x3   :  { %3030 = sst [smem:[#allocation35_spill]] %s2999_s2 }
   0x4   :  { %3031 = sst [smem:[#allocation36_spill]] %s3000_s3 }
   0x5   :  { %3032 = sst [smem:[#allocation37_spill]] %s3001_s4 }
   0x6   :  { %3033 = sst [smem:[#allocation38_spill]] %s3002_s5 }
   0x7   :  { %3034 = sst [smem:[#allocation39_spill]] %s3003_s6 }
   0x8   :  { %3035 = sst [smem:[#allocation40_spill]] %s3018_s22 }
   0x9   :  { %31 = vsyncpa [#allocation5], 0 }
   0xa   :  { %32 = vsyncpa [#allocation8], 0 }
   0xb   :  { %33 = vsyncpa [#allocation11], 0 }
   0xc   :  { %34 = vsyncpa [#allocation14], 0 }
   0xd   :  { %35 = vsyncpa [#allocation17], 0 }
   0xe   :  { %36 = vsyncpa [#allocation20], 0 }
   0xf   :  { %37 = vsyncpa [#allocation23], 0 }
  0x10   :  { %38 = vsyncpa [#allocation6], 0  ;;  %s2359_s4 = smov [#allocation7]   ;;  %s2360_s23 = smov [#allocation10]  }
  0x11   :  { %s56_s0 = sshll.u32 %s2359_s4, 4  ;;  %s80_s1 = sshll.u32 %s2360_s23, 4  ;;  %s57_s0 = int_to_ptr.vmem [resolvable:$true] %s56_s0  ;;  %s2504_s1 = int_to_ptr.vmem [resolvable:$true] %s80_s1 }
  0x12   :  { %s3036_s16 = sld [smem:[#allocation34_spill]] }
  0x18   :  { %s2057_s24 = scalar_lea.hbm %s3036_s16, 256 }
  0x19   :  { %p2058_p0 = scmp.ne.s32.totalorder %s3036_s16, %s2057_s24  ;;  %p2061_p1 = scmp.lt.u32.totalorder %s2057_s24, %s3036_s16 }
  0x1b   :  { %p2063_p2 = pnand %p2061_p1, %p2058_p0 }
  0x1d   :  { %2066 = shalt.err (!%p2063_p2)
}
  0x1e   :  { %s2067_s27 = scalar_lea.vmem %s57_s0, 256  ;;  %p2072_p4 = scmp.lt.s32.totalorder %s57_s0, %s57_s0 }
  0x1f   :  { %p2068_p3 = scmp.ne.s32.totalorder %s57_s0, %s2067_s27  ;;  %p2073_p5 = scmp.lt.s32.totalorder %s2067_s27, %s2067_s27 }
  0x21   :  { %p2074_p6 = por %p2073_p5, %p2072_p4 }
  0x23   :  { %p2075_p7 = pnand %p2074_p6, %p2068_p3 }
  0x25   :  { %2078 = shalt.err (!%p2075_p7)
}
  0x26   :  { %s2361_s3 = smov 128   ;;  %s2362_s28 = smov 8  }
  0x27   :  { %62 = dma.hbm_to_vmem [thread:$0]  %s3036_s16, 256, %s57_s0, [#allocation8], %s2361_s3, %s2361_s3, %s2362_s28  }
  0x28   :  { %s3037_s12 = sld [smem:[#allocation36_spill]] }
  0x2e   :  { %s2079_s5 = scalar_lea.hbm %s3037_s12, 512 }
  0x2f   :  { %p2080_p8 = scmp.ne.s32.totalorder %s3037_s12, %s2079_s5  ;;  %p2083_p9 = scmp.lt.u32.totalorder %s2079_s5, %s3037_s12 }
  0x31   :  { %p2085_p10 = pnand %p2083_p9, %p2080_p8 }
  0x33   :  { %2088 = shalt.err (!%p2085_p10)
}
  0x34   :  { %s2089_s2 = scalar_lea.vmem %s2504_s1, 512  ;;  %p2094_p12 = scmp.lt.s32.totalorder %s2504_s1, %s2504_s1 }
  0x35   :  { %p2090_p11 = scmp.ne.s32.totalorder %s2504_s1, %s2089_s2  ;;  %p2095_p13 = scmp.lt.s32.totalorder %s2089_s2, %s2089_s2 }
  0x37   :  { %p2096_p0 = por %p2095_p13, %p2094_p12 }
  0x39   :  { %p2097_p1 = pnand %p2096_p0, %p2090_p11 }
  0x3b   :  { %2100 = shalt.err (!%p2097_p1)
}
  0x3c   :  { %86 = dma.hbm_to_vmem [thread:$0]  %s3037_s12, 512, %s2504_s1, [#allocation11], %s2361_s3, %s2361_s3, %s2362_s28  }
  0x3d   :  { %s2363_s27 = smov [#allocation13]   ;;  %s2364_s30 = smov [#allocation16]  }
  0x3e   :  { %s105_s29 = sshll.u32 %s2363_s27, 4  ;;  %s126_s4 = sshll.u32 %s2364_s30, 4  ;;  %s106_s29 = int_to_ptr.vmem [resolvable:$true] %s105_s29  ;;  %s2541_s4 = int_to_ptr.vmem [resolvable:$true] %s126_s4 }
  0x3f   :  { %s3038_s24 = sld [smem:[#allocation39_spill]] }
  0x45   :  { %s2101_s6 = scalar_lea.hbm %s3038_s24, 16 }
  0x46   :  { %p2102_p2 = scmp.ne.s32.totalorder %s3038_s24, %s2101_s6  ;;  %p2105_p3 = scmp.lt.u32.totalorder %s2101_s6, %s3038_s24 }
  0x48   :  { %p2107_p4 = pnand %p2105_p3, %p2102_p2 }
  0x4a   :  { %2110 = shalt.err (!%p2107_p4)
}
  0x4b   :  { %s2111_s1 = scalar_lea.vmem %s106_s29, 16  ;;  %s2115_s12 = scalar_lea.vmem %s106_s29, 32 }
  0x4c   :  { %p2112_p5 = scmp.ne.s32.totalorder %s106_s29, %s2111_s1  ;;  %p2116_p6 = scmp.lt.s32.totalorder %s106_s29, %s106_s29 }
  0x4d   :  { %p2117_p7 = scmp.lt.s32.totalorder %s2115_s12, %s2111_s1 }
  0x4f   :  { %p2118_p8 = por %p2117_p7, %p2116_p6 }
  0x51   :  { %p2119_p9 = pnand %p2118_p8, %p2112_p5 }
  0x53   :  { %2122 = shalt.err (!%p2119_p9)
}
  0x54   :  { %108 = dma.hbm_to_vmem [thread:$0]  %s3038_s24, 16, %s106_s29, [#allocation14]  }
  0x55   :  { %s2123_s23 = scalar_lea.hbm %s3006_s9, 2048 }
  0x56   :  { %p2124_p10 = scmp.ne.s32.totalorder %s3006_s9, %s2123_s23  ;;  %p2127_p11 = scmp.lt.u32.totalorder %s2123_s23, %s3006_s9 }
  0x58   :  { %p2129_p12 = pnand %p2127_p11, %p2124_p10 }
  0x5a   :  { %2132 = shalt.err (!%p2129_p12)
}
  0x5b   :  { %s2133_s26 = scalar_lea.vmem %s2541_s4, 2048  ;;  %p2138_p0 = scmp.lt.s32.totalorder %s2541_s4, %s2541_s4 }
  0x5c   :  { %p2134_p13 = scmp.ne.s32.totalorder %s2541_s4, %s2133_s26  ;;  %p2139_p1 = scmp.lt.s32.totalorder %s2133_s26, %s2133_s26 }
  0x5e   :  { %p2140_p2 = por %p2139_p1, %p2138_p0 }
  0x60   :  { %p2141_p3 = pnand %p2140_p2, %p2134_p13 }
  0x62   :  { %2144 = shalt.err (!%p2141_p3)
}
  0x63   :  { %132 = dma.hbm_to_vmem [thread:$0]  %s3006_s9, 2048, %s2541_s4, [#allocation17], %s2361_s3, %s2361_s3, %s2362_s28  }
  0x64   :  { %s2365_s2 = smov [#allocation19]   ;;  %s2366_s12 = smov [#allocation4]  }
  0x65   :  { %s155_s1 = sshll.u32 %s2365_s2, 4  ;;  %s44_s0 = sshll.u32 %s2366_s12, 4  ;;  %s156_s1 = int_to_ptr.vmem [resolvable:$true] %s155_s1  ;;  %s2575_s0 = int_to_ptr.vmem [resolvable:$true] %s44_s0 }
  0x66   :  { %s2145_s30 = scalar_lea.hbm %s3011_s14, 16 }
  0x67   :  { %p2146_p4 = scmp.ne.s32.totalorder %s3011_s14, %s2145_s30  ;;  %p2149_p5 = scmp.lt.u32.totalorder %s2145_s30, %s3011_s14 }
  0x69   :  { %p2151_p6 = pnand %p2149_p5, %p2146_p4 }
  0x6b   :  { %2154 = shalt.err (!%p2151_p6)
}
  0x6c   :  { %s2155_s9 = scalar_lea.vmem %s156_s1, 16  ;;  %s2159_s4 = scalar_lea.vmem %s156_s1, 32 }
  0x6d   :  { %p2156_p7 = scmp.ne.s32.totalorder %s156_s1, %s2155_s9  ;;  %p2160_p8 = scmp.lt.s32.totalorder %s156_s1, %s156_s1 }
  0x6e   :  { %p2161_p9 = scmp.lt.s32.totalorder %s2159_s4, %s2155_s9 }
  0x70   :  { %p2162_p10 = por %p2161_p9, %p2160_p8 }
  0x72   :  { %p2163_p11 = pnand %p2162_p10, %p2156_p7 }
  0x74   :  { %2166 = shalt.err (!%p2163_p11)
}
  0x75   :  { %158 = dma.hbm_to_vmem [thread:$0]  %s3011_s14, 16, %s156_s1, [#allocation20]  }
  0x76   :  { %s3039_s2 = sld [smem:[#allocation33_spill]] }
  0x7c   :  { %s2167_s12 = scalar_lea.hbm %s3039_s2, 256 }
  0x7d   :  { %p2168_p12 = scmp.ne.s32.totalorder %s3039_s2, %s2167_s12  ;;  %p2171_p13 = scmp.lt.u32.totalorder %s2167_s12, %s3039_s2 }
  0x7f   :  { %p2173_p0 = pnand %p2171_p13, %p2168_p12 }
  0x81   :  { %2176 = shalt.err (!%p2173_p0)
}
  0x82   :  { %s2177_s22 = scalar_lea.vmem %s2575_s0, 256  ;;  %p2182_p2 = scmp.lt.s32.totalorder %s2575_s0, %s2575_s0 }
  0x83   :  { %p2178_p1 = scmp.ne.s32.totalorder %s2575_s0, %s2177_s22  ;;  %p2183_p3 = scmp.lt.s32.totalorder %s2177_s22, %s2177_s22 }
  0x85   :  { %p2184_p4 = por %p2183_p3, %p2182_p2 }
  0x87   :  { %p2185_p5 = pnand %p2184_p4, %p2178_p1 }
  0x89   :  { %2188 = shalt.err (!%p2185_p5)
}
  0x8a   :  { %50 = dma.hbm_to_vmem [thread:$0]  %s3039_s2, 256, %s2575_s0, [#allocation5], %s2361_s3, %s2361_s3, %s2362_s28  }
  0x8b   :  { %s2367_s5 = smov [#allocation9]   ;;  %s2368_s9 = smov [#allocation12]  }
  0x8c   :  { %s68_s6 = sshll.u32 %s2367_s5, 4  ;;  %s95_s4 = sshll.u32 %s2368_s9, 4  ;;  %s69_s6 = int_to_ptr.vmem [resolvable:$true] %s68_s6  ;;  %s96_s4 = int_to_ptr.vmem [resolvable:$true] %s95_s4 }
  0x8d   :  { %s3040_s29 = sld [smem:[#allocation35_spill]] }
  0x93   :  { %s2189_s24 = scalar_lea.hbm %s3040_s29, 256 }
  0x94   :  { %p2190_p6 = scmp.ne.s32.totalorder %s3040_s29, %s2189_s24  ;;  %p2193_p7 = scmp.lt.u32.totalorder %s2189_s24, %s3040_s29 }
  0x96   :  { %p2195_p8 = pnand %p2193_p7, %p2190_p6 }
  0x98   :  { %2198 = shalt.err (!%p2195_p8)
}
  0x99   :  { %s2199_s0 = scalar_lea.vmem %s69_s6, 256  ;;  %p2204_p10 = scmp.lt.s32.totalorder %s69_s6, %s69_s6 }
  0x9a   :  { %p2200_p9 = scmp.ne.s32.totalorder %s69_s6, %s2199_s0  ;;  %p2205_p11 = scmp.lt.s32.totalorder %s2199_s0, %s2199_s0 }
  0x9c   :  { %p2206_p12 = por %p2205_p11, %p2204_p10 }
  0x9e   :  { %p2207_p13 = pnand %p2206_p12, %p2200_p9 }
  0xa0   :  { %2210 = shalt.err (!%p2207_p13)
}
  0xa1   :  { %74 = dma.hbm_to_vmem [thread:$0]  %s3040_s29, 256, %s69_s6, [#allocation8], %s2361_s3, %s2361_s3, %s2362_s28  }
  0xa2   :  { %s3041_s1 = sld [smem:[#allocation38_spill]] }
  0xa8   :  { %s2211_s5 = scalar_lea.hbm %s3041_s1, 256 }
  0xa9   :  { %p2212_p0 = scmp.ne.s32.totalorder %s3041_s1, %s2211_s5  ;;  %p2215_p1 = scmp.lt.u32.totalorder %s2211_s5, %s3041_s1 }
  0xab   :  { %p2217_p2 = pnand %p2215_p1, %p2212_p0 }
  0xad   :  { %2220 = shalt.err (!%p2217_p2)
}
  0xae   :  { %s2221_s12 = scalar_lea.vmem %s96_s4, 256  ;;  %p2226_p4 = scmp.lt.s32.totalorder %s96_s4, %s96_s4 }
  0xaf   :  { %p2222_p3 = scmp.ne.s32.totalorder %s96_s4, %s2221_s12  ;;  %p2227_p5 = scmp.lt.s32.totalorder %s2221_s12, %s2221_s12 }
  0xb1   :  { %p2228_p6 = por %p2227_p5, %p2226_p4 }
  0xb3   :  { %p2229_p7 = pnand %p2228_p6, %p2222_p3 }
  0xb5   :  { %2232 = shalt.err (!%p2229_p7)
}
  0xb6   :  { %98 = dma.hbm_to_vmem [thread:$0]  %s3041_s1, 256, %s96_s4, [#allocation11]  }
  0xb7   :  { %s2369_s16 = smov [#allocation15]   ;;  %s2370_s30 = smov [#allocation18]  }
  0xb8   :  { %s117_s27 = sshll.u32 %s2369_s16, 4  ;;  %s139_s0 = sshll.u32 %s2370_s30, 4  ;;  %s118_s27 = int_to_ptr.vmem [resolvable:$true] %s117_s27  ;;  %s140_s0 = int_to_ptr.vmem [resolvable:$true] %s139_s0 }
  0xb9   :  { %s2233_s22 = scalar_lea.hbm %s3005_s8, 16 }
  0xba   :  { %p2234_p8 = scmp.ne.s32.totalorder %s3005_s8, %s2233_s22  ;;  %p2237_p9 = scmp.lt.u32.totalorder %s2233_s22, %s3005_s8 }
  0xbc   :  { %p2239_p10 = pnand %p2237_p9, %p2234_p8 }
  0xbe   :  { %2242 = shalt.err (!%p2239_p10)
}
  0xbf   :  { %s2243_s4 = scalar_lea.vmem %s118_s27, 16  ;;  %s2247_s1 = scalar_lea.vmem %s118_s27, 32 }
  0xc0   :  { %p2244_p11 = scmp.ne.s32.totalorder %s118_s27, %s2243_s4  ;;  %p2248_p12 = scmp.lt.s32.totalorder %s118_s27, %s118_s27 }
  0xc1   :  { %p2249_p13 = scmp.lt.s32.totalorder %s2247_s1, %s2243_s4 }
  0xc3   :  { %p2250_p0 = por %p2249_p13, %p2248_p12 }
  0xc5   :  { %p2251_p1 = pnand %p2250_p0, %p2244_p11 }
  0xc7   :  { %2254 = shalt.err (!%p2251_p1)
}
  0xc8   :  { %120 = dma.hbm_to_vmem [thread:$0]  %s3005_s8, 16, %s118_s27, [#allocation14]  }
  0xc9   :  { %s2255_s29 = scalar_lea.hbm %s3007_s10, 16 }
  0xca   :  { %p2256_p2 = scmp.ne.s32.totalorder %s3007_s10, %s2255_s29  ;;  %p2259_p3 = scmp.lt.u32.totalorder %s2255_s29, %s3007_s10 }
  0xcc   :  { %p2261_p4 = pnand %p2259_p3, %p2256_p2 }
  0xce   :  { %2264 = shalt.err (!%p2261_p4)
}
  0xcf   :  { %s2265_s22 = scalar_lea.vmem %s140_s0, 16  ;;  %s2269_s14 = scalar_lea.vmem %s140_s0, 32 }
  0xd0   :  { %p2266_p5 = scmp.ne.s32.totalorder %s140_s0, %s2265_s22  ;;  %p2270_p6 = scmp.lt.s32.totalorder %s140_s0, %s140_s0 }
  0xd1   :  { %p2271_p7 = scmp.lt.s32.totalorder %s2269_s14, %s2265_s22 }
  0xd3   :  { %p2272_p8 = por %p2271_p7, %p2270_p6 }
  0xd5   :  { %p2273_p9 = pnand %p2272_p8, %p2266_p5 }
  0xd7   :  { %2276 = shalt.err (!%p2273_p9)
}
  0xd8   :  { %142 = dma.hbm_to_vmem [thread:$0]  %s3007_s10, 16, %s140_s0, [#allocation17]  }
  0xd9   :  { %s2371_s5 = smov [#allocation21]   ;;  %s2372_s25 = smov [#allocation22]  }
  0xda   :  { %s165_s9 = sshll.u32 %s2371_s5, 4  ;;  %s182_s4 = sshll.u32 %s2372_s25, 4  ;;  %s166_s9 = int_to_ptr.vmem [resolvable:$true] %s165_s9  ;;  %s2660_s4 = int_to_ptr.vmem [resolvable:$true] %s182_s4 }
  0xdb   :  { %s2277_s24 = scalar_lea.hbm %s3012_s15, 16 }
  0xdc   :  { %p2278_p10 = scmp.ne.s32.totalorder %s3012_s15, %s2277_s24  ;;  %p2281_p11 = scmp.lt.u32.totalorder %s2277_s24, %s3012_s15 }
  0xde   :  { %p2283_p12 = pnand %p2281_p11, %p2278_p10 }
  0xe0   :  { %2286 = shalt.err (!%p2283_p12)
}
  0xe1   :  { %s2287_s10 = scalar_lea.vmem %s166_s9, 16  ;;  %s2291_s0 = scalar_lea.vmem %s166_s9, 32 }
  0xe2   :  { %p2288_p13 = scmp.ne.s32.totalorder %s166_s9, %s2287_s10  ;;  %p2292_p0 = scmp.lt.s32.totalorder %s166_s9, %s166_s9 }
  0xe3   :  { %p2293_p1 = scmp.lt.s32.totalorder %s2291_s0, %s2287_s10 }
  0xe5   :  { %p2294_p2 = por %p2293_p1, %p2292_p0 }
  0xe7   :  { %p2295_p3 = pnand %p2294_p2, %p2288_p13 }
  0xe9   :  { %2298 = shalt.err (!%p2295_p3)
}
  0xea   :  { %168 = dma.hbm_to_vmem [thread:$0]  %s3012_s15, 16, %s166_s9, [#allocation20]  }
  0xeb   :  { %s2299_s14 = scalar_lea.hbm %s3016_s20, 512 }
  0xec   :  { %p2300_p4 = scmp.ne.s32.totalorder %s3016_s20, %s2299_s14  ;;  %p2303_p5 = scmp.lt.u32.totalorder %s2299_s14, %s3016_s20 }
  0xee   :  { %p2305_p6 = pnand %p2303_p5, %p2300_p4 }
  0xf0   :  { %2308 = shalt.err (!%p2305_p6)
}
  0xf1   :  { %s2309_s1 = scalar_lea.vmem %s2660_s4, 512  ;;  %p2314_p8 = scmp.lt.s32.totalorder %s2660_s4, %s2660_s4 }
  0xf2   :  { %p2310_p7 = scmp.ne.s32.totalorder %s2660_s4, %s2309_s1  ;;  %p2315_p9 = scmp.lt.s32.totalorder %s2309_s1, %s2309_s1 }
  0xf4   :  { %p2316_p10 = por %p2315_p9, %p2314_p8 }
  0xf6   :  { %p2317_p11 = pnand %p2316_p10, %p2310_p7 }
  0xf8   :  { %2320 = shalt.err (!%p2317_p11)
}
  0xf9   :  { %188 = dma.hbm_to_vmem [thread:$0]  %s3016_s20, 512, %s2660_s4, [#allocation23], %s2361_s3, %s2361_s3, %s2362_s28  }
  0xfa   :  { %2343 = dma.done.wait [#allocation5], 256  }
  0xfb   :  { %2344 = vsyncadd [#allocation5], 4294967040 }
  0xfc   :  { %2345 = dma.done.wait [#allocation8], 512  }
  0xfd   :  { %2346 = vsyncadd [#allocation8], 4294966784 }
  0xfe   :  { %2347 = dma.done.wait [#allocation11], 768  }
  0xff   :  { %2348 = vsyncadd [#allocation11], 4294966528 }
 0x100   :  { %2349 = dma.done.wait [#allocation14], 32  }
 0x101   :  { %2350 = vsyncadd [#allocation14], 4294967264 }
 0x102   :  { %2351 = dma.done.wait [#allocation17], 2064  }
 0x103   :  { %2352 = vsyncadd [#allocation17], 4294965232 }
 0x104   :  { %2353 = dma.done.wait [#allocation20], 32  }
 0x105   :  { %2354 = vsyncadd [#allocation20], 4294967264 }
 0x106   :  { %2355 = dma.done.wait [#allocation23], 512  }
 0x107   :  { %2356 = vsyncadd [#allocation23], 4294966784  ;;  %v2373_v2 = vmov 0.0   ;;  %s3042_s12 = sld [smem:[#allocation37_spill]]  ;;  %v234_v11 = vld [vmem:[#allocation12 + $0x8] sm:$0xff]  ;;  %v233_v12 = vld [vmem:[#allocation12] sm:$0xff] }
 0x108   :  { %306 = vmatprep.mubr.f32.mxu0 %v2373_v2  ;;  %v2712_v13 = vld [vmem:[#allocation9] sm:$0xff]  ;;  %vm235_vm0 = vcmask 64512   ;;  %242 = vmatprep.subr.mxu0 %v234_v11  ;;  %v319_v15 = vld [vmem:[#allocation10] sm:$0xff]  ;;  %v320_v16 = vld [vmem:[#allocation10 + $0x8] sm:$0xff]  ;;  %vm414_vm1 = vcmask 261120   ;;  %s2376_s4 = smov 124  }
 0x109   :  { %243 = vmatpush1.msra.mxu0 %v233_v12  ;;  %v1823_v19 = vpack.c.bf16 %v320_v16, %v319_v15  ;;  %v321_v20 = vld [vmem:[#allocation10 + $0x10] sm:$0xff]  ;;  %v322_v21 = vld [vmem:[#allocation10 + $0x18] sm:$0xff]  ;;  %v229_v24 = vld [vmem:[#allocation7] sm:$0xff]  ;;  %s2378_s16 = smov 116   ;;  %vm854_vm2 = vcmask 31744   ;;  %vm917_vm3 = vcmask 7168  }
 0x10a   :  { %1429 = vmatmul.mubr.msk.f32.vlgmr.msra.gmra.mrb[0].mxu0 %vm235_vm0, %v2712_v13  ;;  %v2722_v22 = vld [vmem:[#allocation9 + $0x8] sm:$0xff]  ;;  %v1827_v23 = vpack.c.bf16 %v322_v21, %v321_v20  ;;  %v2724_v26 = vld [vmem:[#allocation4] sm:$0xff]  ;;  %1604 = vmatprep.mubr.f32.mxu1 %v229_v24  ;;  %v230_v40 = vld [vmem:[#allocation7 + $0x8] sm:$0xff]  ;;  %s2380_s30 = smov 126   ;;  %s2381_s2 = smov 16   ;;  %vm1385_vm4 = vcmask 277760  }
 0x10b   :  { %1824 = vmatprep.subr.bf16.mxu0 %v1823_v19  ;;  %312 = vmatprep.mubr.f32.mxu0 %v2373_v2  ;;  %v2736_v30 = vld [vmem:[#allocation4 + $0x8] sm:$0xff]  ;;  %v521_v41 = vld [vmem:[%s3004_s7] sm:$0xff]  ;;  %v524_v45 = vld [vmem:[%s3004_s7 + $0x18] sm:$0xff]  ;;  %vm1394_vm5 = vcmask 294160   ;;  %s2382_s23 = smov [#allocation24]   ;;  %vm1403_vm6 = vcmask 310560  }
 0x10c   :  { %1826 = vmatpush3.bf16.msra.mxu0 %v1823_v19  ;;  %v522_v42 = vld [vmem:[%s3004_s7 + $0x8] sm:$0xff]  ;;  %v523_v44 = vld [vmem:[%s3004_s7 + $0x10] sm:$0xff]  ;;  %v525_v47 = vld [vmem:[%s3004_s7 + $0x20] sm:$0xff]  ;;  %s1411_s22 = sshll.u32 %s2382_s23, 4  ;;  %s1412_s22 = int_to_ptr.vmem [resolvable:$true] %s1411_s22 }
 0x10d   :  { %v323_v3 = vld [vmem:[%s3042_s12] sm:$0xff]  ;;  %v324_v4 = vld [vmem:[%s3042_s12 + $0x8] sm:$0xff]  ;;  %v325_v5 = vld [vmem:[%s3042_s12 + $0x10] sm:$0xff]  ;;  %1828 = vmatprep.subr.bf16.mxu0 %v1827_v23  ;;  %v1831_v43 = vpack.c.bf16 %v522_v42, %v521_v41  ;;  %v1835_v46 = vpack.c.bf16 %v524_v45, %v523_v44  ;;  %s2321_s14 = scalar_lea.vmem %s1412_s22, 256  ;;  %p2326_p13 = scmp.lt.s32.totalorder %s1412_s22, %s1412_s22 }
 0x10e   :  { %v1791_v6 = vpack.c.bf16 %v324_v4, %v323_v3  ;;  %v326_v7 = vld [vmem:[%s3042_s12 + $0x18] sm:$0xff]  ;;  %v327_v9 = vld [vmem:[%s3042_s12 + $0x20] sm:$0xff]  ;;  %v328_v10 = vld [vmem:[%s3042_s12 + $0x28] sm:$0xff]  ;;  %1430 = vmatmul.mubr.msk.f32.gmra.mrb[2].mxu0 %vm235_vm0, %v2722_v22  ;;  %p2322_p12 = scmp.ne.s32.totalorder %s1412_s22, %s2321_s14  ;;  %p2327_p0 = scmp.lt.s32.totalorder %s2321_s14, %s2321_s14 }
 0x10f   :  { %v1795_v8 = vpack.c.bf16 %v326_v7, %v325_v5  ;;  %v1799_v14 = vpack.c.bf16 %v328_v10, %v327_v9  ;;  %v329_v17 = vld [vmem:[%s3042_s12 + $0x30] sm:$0xff]  ;;  %v330_v18 = vld [vmem:[%s3042_s12 + $0x38] sm:$0xff]  ;;  %v331_v27 = vld [vmem:[%s3042_s12 + $0x40] sm:$0xff]  ;;  %1615 = vmatprep.mubr.msk.f32.mxu0 %vm414_vm1, %v2724_v26 }
 0x110   :  { %1792 = vmatprep.subr.bf16.mxu1 %v1791_v6  ;;  %v1803_v25 = vpack.c.bf16 %v330_v18, %v329_v17  ;;  %v332_v28 = vld [vmem:[%s3042_s12 + $0x48] sm:$0xff]  ;;  %1830 = vmatpush3.bf16.msra.mxu0 %v1827_v23  ;;  %v333_v31 = vld [vmem:[%s3042_s12 + $0x50] sm:$0xff]  ;;  %v334_v32 = vld [vmem:[%s3042_s12 + $0x58] sm:$0xff]  ;;  %p2328_p1 = por %p2327_p0, %p2326_p13 }
 0x111   :  { %1794 = vmatpush3.bf16.msra.mxu1 %v1791_v6  ;;  %v1807_v29 = vpack.c.bf16 %v332_v28, %v331_v27  ;;  %v1811_v33 = vpack.c.bf16 %v334_v32, %v333_v31  ;;  %v335_v34 = vld [vmem:[%s3042_s12 + $0x60] sm:$0xff]  ;;  %v336_v35 = vld [vmem:[%s3042_s12 + $0x68] sm:$0xff]  ;;  %v337_v37 = vld [vmem:[%s3042_s12 + $0x70] sm:$0xff]  ;;  %1832 = vmatprep.subr.bf16.mxu0 %v1831_v43 }
 0x112   :  { %1796 = vmatprep.subr.bf16.mxu1 %v1795_v8  ;;  %v1815_v36 = vpack.c.bf16 %v336_v35, %v335_v34  ;;  %v338_v38 = vld [vmem:[%s3042_s12 + $0x78] sm:$0xff]  ;;  %v526_v48 = vld [vmem:[%s3004_s7 + $0x28] sm:$0xff]  ;;  %v527_v50 = vld [vmem:[%s3004_s7 + $0x30] sm:$0xff]  ;;  %p2329_p2 = pnand %p2328_p1, %p2322_p12 }
 0x113   :  { %1616 = vmatmul.mubr.msk.f32.vlgmr.msra.gmra.mrb[4].mxu0 %vm414_vm1, %v2736_v30  ;;  %v1819_v39 = vpack.c.bf16 %v338_v38, %v337_v37  ;;  %v1839_v49 = vpack.c.bf16 %v526_v48, %v525_v47  ;;  %v528_v51 = vld [vmem:[%s3004_s7 + $0x38] sm:$0xff]  ;;  %v529_v53 = vld [vmem:[%s3004_s7 + $0x40] sm:$0xff]  ;;  %v530_v54 = vld [vmem:[%s3004_s7 + $0x48] sm:$0xff] }
 0x114   :  { %1834 = vmatpush3.bf16.msra.mxu0 %v1831_v43  ;;  %v1843_v52 = vpack.c.bf16 %v528_v51, %v527_v50  ;;  %v1847_v55 = vpack.c.bf16 %v530_v54, %v529_v53  ;;  %v531_v56 = vld [vmem:[%s3004_s7 + $0x50] sm:$0xff]  ;;  %v532_v57 = vld [vmem:[%s3004_s7 + $0x58] sm:$0xff]  ;;  %v533_v59 = vld [vmem:[%s3004_s7 + $0x60] sm:$0xff] }
 0x115   :  { %1798 = vmatpush3.bf16.msra.mxu1 %v1795_v8  ;;  %1836 = vmatprep.subr.bf16.mxu0 %v1835_v46  ;;  %v1851_v58 = vpack.c.bf16 %v532_v57, %v531_v56  ;;  %v534_v60 = vld [vmem:[%s3004_s7 + $0x68] sm:$0xff]  ;;  %v535_v62 = vld [vmem:[%s3004_s7 + $0x70] sm:$0xff]  ;;  %v536_v63 = vld [vmem:[%s3004_s7 + $0x78] sm:$0xff] }
 0x116   :  { %1800 = vmatprep.subr.bf16.mxu1 %v1799_v14  ;;  %v1855_v61 = vpack.c.bf16 %v534_v60, %v533_v59  ;;  %v1859_v0 = vpack.c.bf16 %v536_v63, %v535_v62  ;;  %v1433_v10 = vld [vmem:[#allocation13] ss:$0 sm:$0xff]  ;;  %v636_v31 = vld [vmem:[#allocation16 + $0x8] sm:$0xff]  ;;  %v643_v42 = vld [vmem:[#allocation16 + $0x40] sm:$0xff] }
 0x117   :  { %v638_v34 = vld [vmem:[#allocation16 + $0x18] sm:$0xff]  ;;  %v640_v37 = vld [vmem:[#allocation16 + $0x28] sm:$0xff]  ;;  %v645_v45 = vld [vmem:[#allocation16 + $0x50] sm:$0xff] }
 0x118   :  { %1838 = vmatpush3.bf16.msra.mxu0 %v1835_v46  ;;  %v644_v43 = vld [vmem:[#allocation16 + $0x48] sm:$0xff]  ;;  %v646_v46 = vld [vmem:[#allocation16 + $0x58] sm:$0xff]  ;;  %v647_v48 = vld [vmem:[#allocation16 + $0x60] sm:$0xff] }
 0x119   :  { %1802 = vmatpush3.bf16.msra.mxu1 %v1799_v14  ;;  %1840 = vmatprep.subr.bf16.mxu0 %v1839_v49  ;;  %v1879_v44 = vpack.c.bf16 %v644_v43, %v643_v42  ;;  %v1883_v47 = vpack.c.bf16 %v646_v46, %v645_v45  ;;  %v649_v51 = vld [vmem:[#allocation16 + $0x70] sm:$0xff]  ;;  %v1436_v54 = vld [vmem:[#allocation15] ss:$0 sm:$0xff]  ;;  %v1087_v45 = vld [vmem:[%s3013_s17 + $0x8] sm:$0xff] }
 0x11a   :  { %1804 = vmatprep.subr.bf16.mxu1 %v1803_v25  ;;  %v923_v42 = vld [vmem:[%s3010_s13 + $0x18] sm:$0xff] }
 0x11c   :  { %1842 = vmatpush3.bf16.msra.mxu0 %v1839_v49  ;;  %v648_v49 = vld [vmem:[#allocation16 + $0x68] sm:$0xff] }
 0x11d   :  { %1806 = vmatpush3.bf16.msra.mxu1 %v1803_v25  ;;  %1844 = vmatprep.subr.bf16.mxu0 %v1843_v52  ;;  %v1887_v50 = vpack.c.bf16 %v648_v49, %v647_v48  ;;  %v1089_v48 = vld [vmem:[%s3013_s17 + $0x18] sm:$0xff] }
 0x11e   :  { %1808 = vmatprep.subr.bf16.mxu1 %v1807_v29 }
 0x120   :  { %1846 = vmatpush3.bf16.msra.mxu0 %v1843_v52  ;;  %v650_v52 = vld [vmem:[#allocation16 + $0x78] sm:$0xff] }
 0x121   :  { %1810 = vmatpush3.bf16.msra.mxu1 %v1807_v29  ;;  %1848 = vmatprep.subr.bf16.mxu0 %v1847_v55  ;;  %v635_v29 = vld [vmem:[#allocation16] sm:$0xff]  ;;  %v1891_v53 = vpack.c.bf16 %v650_v52, %v649_v51  ;;  %v2374_v51 = vmov 0  }
 0x122   :  { %1812 = vmatprep.subr.bf16.mxu1 %v1811_v33  ;;  %v1863_v32 = vpack.c.bf16 %v636_v31, %v635_v29  ;;  %v760_v29 = vld [vmem:[%s3008_s11 + $0x68] sm:$0xff]  ;;  %2011 = vset.pattern.permute.xlu0 %v2374_v51  ;;  %v1439_v52 = vld [vmem:[#allocation18] ss:$0 sm:$0xff] }
 0x123   :  { %2012 = vset.pattern.permute.xlu1 %v2374_v51 }
 0x124   :  { %1850 = vmatpush3.bf16.msra.mxu0 %v1847_v55 }
 0x125   :  { %1814 = vmatpush3.bf16.msra.mxu1 %v1811_v33  ;;  %1852 = vmatprep.subr.bf16.mxu0 %v1851_v58  ;;  %v637_v33 = vld [vmem:[#allocation16 + $0x10] sm:$0xff] }
 0x126   :  { %1816 = vmatprep.subr.bf16.mxu1 %v1815_v36  ;;  %v1867_v35 = vpack.c.bf16 %v638_v34, %v637_v33  ;;  %v762_v33 = vld [vmem:[%s3008_s11 + $0x78] sm:$0xff] }
 0x128   :  { %1854 = vmatpush3.bf16.msra.mxu0 %v1851_v58 }
 0x129   :  { %1818 = vmatpush3.bf16.msra.mxu1 %v1815_v36  ;;  %1856 = vmatprep.subr.bf16.mxu0 %v1855_v61  ;;  %v639_v36 = vld [vmem:[#allocation16 + $0x20] sm:$0xff] }
 0x12a   :  { %1820 = vmatprep.subr.bf16.mxu1 %v1819_v39  ;;  %v1871_v38 = vpack.c.bf16 %v640_v37, %v639_v36  ;;  %v1091_v36 = vld [vmem:[%s3014_s18 + $0x8] sm:$0xff] }
 0x12c   :  { %1858 = vmatpush3.bf16.msra.mxu0 %v1855_v61 }
 0x12d   :  { %1822 = vmatpush3.bf16.msra.mxu1 %v1819_v39  ;;  %1860 = vmatprep.subr.bf16.mxu0 %v1859_v0  ;;  %v641_v39 = vld [vmem:[#allocation16 + $0x30] sm:$0xff] }
 0x130   :  { %1605 = vmatmul.mubr.f32.vlgmr.msra.gmra.mrb[0].mxu1 %v230_v40  ;;  %1862 = vmatpush3.bf16.msra.mxu0 %v1859_v0  ;;  %v642_v40 = vld [vmem:[#allocation16 + $0x38] sm:$0xff] }
 0x131   :  { %1864 = vmatprep.subr.bf16.mxu0 %v1863_v32  ;;  %v1875_v41 = vpack.c.bf16 %v642_v40, %v641_v39  ;;  %v921_v39 = vld [vmem:[%s3010_s13 + $0x8] sm:$0xff] }
 0x1dd   :  { %v308_v1 = vpop.f32.mrb[0].mxu0 }
 0x1de   :  { %v2806_v2 = vpop.f32.mrb[1].mxu0 }
 0x1e1   :  { %v314_v3 = vpop.f32.mrb[2].mxu0 }
 0x1e2   :  { %v2808_v4 = vpop.f32.mrb[3].mxu0 }
 0x1e6   :  { %v1617_v5 = vpop.f32.mrb[4].mxu0 }
 0x1e7   :  { %v487_v6 = vpop.f32.mrb[5].mxu0 }
 0x203   :  { %v1606_v7 = vpop.f32.mrb[0].mxu1 }
 0x204   :  { %v493_v8 = vadd.f32 %v1617_v5, %v1606_v7  ;;  %v405_v9 = vpop.f32.mrb[1].mxu1 }
 0x205   :  { %v488_v11 = vadd.f32 %v487_v6, %v405_v9  ;;  %v747_v9 = vld [vmem:[%s3008_s11] sm:$0xff] }
 0x206   :  { %v497_v12 = vadd.f32 %v493_v8, %v314_v3 }
 0x207   :  { %v496_v14 = vadd.f32 %v488_v11, %v308_v1  ;;  %v750_v11 = vld [vmem:[%s3008_s11 + $0x18] sm:$0xff] }
 0x208   :  { %v506_v15 = vadd.f32 %v1433_v10, %v497_v12 }
 0x209   :  { %v505_v16 = vadd.f32 %v1433_v10, %v496_v14  ;;  %v748_v10 = vld [vmem:[%s3008_s11 + $0x8] sm:$0xff]  ;;  %v751_v14 = vld [vmem:[%s3008_s11 + $0x20] sm:$0xff] }
 0x20a   :  { %v1435_v17 = vmul.f32 -1.442695, %v506_v15 }
 0x20b   :  { %v1434_v18 = vmul.f32 -1.442695, %v505_v16 }
 0x20c   :  { %2013 = vpow2.f32 %v1435_v17  ;;  %v753_v17 = vld [vmem:[%s3008_s11 + $0x30] sm:$0xff] }
 0x20d   :  { %2015 = vpow2.f32 %v1434_v18  ;;  %v754_v18 = vld [vmem:[%s3008_s11 + $0x38] sm:$0xff] }
 0x216   :  { %v2014_v19 = vpop.eup %2013 }
 0x217   :  { %v2016_v20 = vpop.eup %2015  ;;  %v514_v21 = vadd.f32 1.0, %v2014_v19  ;;  %v1907_v19 = vpack.c.bf16 %v754_v18, %v753_v17  ;;  %v1100_v17 = vld [vmem:[%s3014_s18 + $0x50] sm:$0xff]  ;;  %v1101_v18 = vld [vmem:[%s3014_s18 + $0x58] sm:$0xff] }
 0x218   :  { %v513_v23 = vadd.f32 1.0, %v2016_v20  ;;  %v755_v20 = vld [vmem:[%s3008_s11 + $0x40] sm:$0xff] }
 0x219   :  { %2017 = vrcp.f32 %v514_v21  ;;  %v756_v21 = vld [vmem:[%s3008_s11 + $0x48] sm:$0xff] }
 0x21a   :  { %2019 = vrcp.f32 %v513_v23  ;;  %v1911_v23 = vpack.c.bf16 %v756_v21, %v755_v20  ;;  %v1102_v20 = vld [vmem:[%s3014_s18 + $0x60] sm:$0xff]  ;;  %v1103_v21 = vld [vmem:[%s3014_s18 + $0x68] sm:$0xff] }
 0x223   :  { %v2018_v24 = vpop.eup %2017 }
 0x224   :  { %v2020_v25 = vpop.eup %2019  ;;  %v520_v28 = vmul.f32 %v2018_v24, %v506_v15  ;;  %v752_v15 = vld [vmem:[%s3008_s11 + $0x28] sm:$0xff]  ;;  %v757_v24 = vld [vmem:[%s3008_s11 + $0x50] sm:$0xff] }
 0x225   :  { %v519_v27 = vmul.f32 %v2020_v25, %v505_v16  ;;  %v1903_v16 = vpack.c.bf16 %v752_v15, %v751_v14  ;;  %v758_v25 = vld [vmem:[%s3008_s11 + $0x58] sm:$0xff]  ;;  %v1098_v15 = vld [vmem:[%s3014_s18 + $0x40] sm:$0xff] }
 0x227   :  { %1650 = vmatprep.mubr.f32.mxu0 %v519_v27  ;;  %v1915_v27 = vpack.c.bf16 %v758_v25, %v757_v24  ;;  %v1104_v24 = vld [vmem:[%s3014_s18 + $0x70] sm:$0xff]  ;;  %v1105_v25 = vld [vmem:[%s3014_s18 + $0x78] sm:$0xff] }
 0x228   :  { %1651 = vmatmul.mubr.f32.vlgmr.msra.gmra.mrb[6].mxu0 %v520_v28  ;;  %v759_v28 = vld [vmem:[%s3008_s11 + $0x60] sm:$0xff] }
 0x229   :  { %1866 = vmatpush3.bf16.msra.mxu0 %v1863_v32  ;;  %v1919_v31 = vpack.c.bf16 %v760_v29, %v759_v28  ;;  %v761_v32 = vld [vmem:[%s3008_s11 + $0x70] sm:$0xff] }
 0x22a   :  { %1868 = vmatprep.subr.bf16.mxu0 %v1867_v35  ;;  %v1923_v34 = vpack.c.bf16 %v762_v33, %v761_v32  ;;  %v1279_v33 = vld [vmem:[#allocation22] sm:$0xff] }
 0x22d   :  { %1870 = vmatpush3.bf16.msra.mxu0 %v1867_v35  ;;  %v1090_v35 = vld [vmem:[%s3014_s18] sm:$0xff] }
 0x22e   :  { %1872 = vmatprep.subr.bf16.mxu0 %v1871_v38  ;;  %v1935_v37 = vpack.c.bf16 %v1091_v36, %v1090_v35  ;;  %v1281_v36 = vld [vmem:[#allocation22 + $0x10] sm:$0xff] }
 0x231   :  { %1874 = vmatpush3.bf16.msra.mxu0 %v1871_v38  ;;  %v920_v38 = vld [vmem:[%s3010_s13] sm:$0xff] }
 0x232   :  { %1876 = vmatprep.subr.bf16.mxu0 %v1875_v41  ;;  %v1927_v40 = vpack.c.bf16 %v921_v39, %v920_v38 }
 0x235   :  { %1878 = vmatpush3.bf16.msra.mxu0 %v1875_v41  ;;  %v922_v41 = vld [vmem:[%s3010_s13 + $0x10] sm:$0xff] }
 0x236   :  { %1880 = vmatprep.subr.bf16.mxu0 %v1879_v44  ;;  %v1931_v43 = vpack.c.bf16 %v923_v42, %v922_v41 }
 0x239   :  { %1882 = vmatpush3.bf16.msra.mxu0 %v1879_v44  ;;  %v1086_v44 = vld [vmem:[%s3013_s17] sm:$0xff] }
 0x23a   :  { %1884 = vmatprep.subr.bf16.mxu0 %v1883_v47  ;;  %v1967_v46 = vpack.c.bf16 %v1087_v45, %v1086_v44  ;;  %v1452_v44 = vld [vmem:[%s3015_s19] ss:$0 sm:$0xff]  ;;  %s2377_s19 = smov 120  }
 0x23d   :  { %1886 = vmatpush3.bf16.msra.mxu0 %v1883_v47  ;;  %v1088_v47 = vld [vmem:[%s3013_s17 + $0x10] sm:$0xff] }
 0x23e   :  { %1888 = vmatprep.subr.bf16.mxu0 %v1887_v50  ;;  %v1971_v49 = vpack.c.bf16 %v1089_v48, %v1088_v47 }
 0x241   :  { %1890 = vmatpush3.bf16.msra.mxu0 %v1887_v50  ;;  %v1442_v50 = vld [vmem:[#allocation2] ss:$0 sm:$0xff] }
 0x242   :  { %1892 = vmatprep.subr.bf16.mxu0 %v1891_v53  ;;  %770 = vperm.xlu0 %2011, %v1442_v50  }
 0x245   :  { %1894 = vmatpush3.bf16.msra.mxu0 %v1891_v53 }
 0x246   :  { %1928 = vmatprep.subr.bf16.mxu0 %v1927_v40 }
 0x2c1   :  { %v771_v39 = vpop.permute.xlu0 %770 }
 0x2fb   :  { %v1652_v55 = vpop.f32.mrb[6].mxu0 }
 0x2fc   :  { %v616_v56 = vadd.f32 %v1652_v55, %v1436_v54  ;;  %v610_v57 = vpop.f32.mrb[7].mxu0 }
 0x2fd   :  { %v611_v58 = vadd.f32 %v1436_v54, %v610_v57 }
 0x2fe   :  { %v1438_v59 = vmul.f32 -1.442695, %v616_v56 }
 0x2ff   :  { %v1437_v60 = vmul.f32 -1.442695, %v611_v58 }
 0x300   :  { %2021 = vpow2.f32 %v1438_v59 }
 0x301   :  { %2023 = vpow2.f32 %v1437_v60 }
 0x30a   :  { %v2022_v61 = vpop.eup %2021 }
 0x30b   :  { %v2024_v62 = vpop.eup %2023  ;;  %v626_v63 = vadd.f32 1.0, %v2022_v61 }
 0x30c   :  { %v625_v0 = vadd.f32 1.0, %v2024_v62 }
 0x30d   :  { %2025 = vrcp.f32 %v626_v63 }
 0x30e   :  { %2027 = vrcp.f32 %v625_v0  ;;  %v1092_v0 = vld [vmem:[%s3014_s18 + $0x10] sm:$0xff] }
 0x317   :  { %v2026_v1 = vpop.eup %2025 }
 0x318   :  { %v2028_v3 = vpop.eup %2027  ;;  %v632_v5 = vmul.f32 %v2026_v1, %v616_v56  ;;  %v1093_v1 = vld [vmem:[%s3014_s18 + $0x18] sm:$0xff] }
 0x319   :  { %v631_v6 = vmul.f32 %v2028_v3, %v611_v58 }
 0x31a   :  { %v2811_v7 = vmul.f32 %v632_v5, %v2808_v4  ;;  %v1895_v4 = vpack.c.bf16 %v748_v10, %v747_v9  ;;  %v1939_v9 = vpack.c.bf16 %v1093_v1, %v1092_v0  ;;  %v1094_v10 = vld [vmem:[%s3014_s18 + $0x20] sm:$0xff] }
 0x31b   :  { %v2814_v8 = vmul.f32 %v631_v6, %v2806_v2  ;;  %v749_v2 = vld [vmem:[%s3008_s11 + $0x10] sm:$0xff] }
 0x31c   :  { %1896 = vmatprep.subr.bf16.mxu1 %v1895_v4  ;;  %v1899_v12 = vpack.c.bf16 %v750_v11, %v749_v2  ;;  %v1096_v11 = vld [vmem:[%s3014_s18 + $0x30] sm:$0xff] }
 0x31d   :  { %1685 = vmatprep.mubr.f32.mxu0 %v2814_v8  ;;  %1898 = vmatpush3.bf16.msra.mxu1 %v1895_v4  ;;  %v1095_v4 = vld [vmem:[%s3014_s18 + $0x28] sm:$0xff] }
 0x31e   :  { %1686 = vmatmul.mubr.f32.vlgmr.msra.gmra.mrb[8].mxu0 %v2811_v7  ;;  %1900 = vmatprep.subr.bf16.mxu1 %v1899_v12  ;;  %v1943_v2 = vpack.c.bf16 %v1095_v4, %v1094_v10 }
 0x31f   :  { %1731 = vmatprep.mubr.msk.f32.mxu0 %vm414_vm1, %v2724_v26  ;;  %1930 = vmatpush3.bf16.msra.mxu0 %v1927_v40 }
 0x320   :  { %1932 = vmatprep.subr.bf16.mxu0 %v1931_v43 }
 0x321   :  { %1902 = vmatpush3.bf16.msra.mxu1 %v1899_v12  ;;  %v1097_v12 = vld [vmem:[%s3014_s18 + $0x38] sm:$0xff] }
 0x322   :  { %1904 = vmatprep.subr.bf16.mxu1 %v1903_v16  ;;  %v1947_v14 = vpack.c.bf16 %v1097_v12, %v1096_v11 }
 0x323   :  { %1934 = vmatpush3.bf16.msra.mxu0 %v1931_v43 }
 0x324   :  { %1968 = vmatprep.subr.bf16.mxu0 %v1967_v46 }
 0x325   :  { %1906 = vmatpush3.bf16.msra.mxu1 %v1903_v16 }
 0x326   :  { %1908 = vmatprep.subr.bf16.mxu1 %v1907_v19  ;;  %1732 = vmatmul.mubr.msk.f32.vlgmr.msra.gmra.mrb[10].mxu0 %vm414_vm1, %v2736_v30 }
 0x327   :  { %1777 = vmatprep.mubr.msk.f32.mxu0 %vm414_vm1, %v2724_v26  ;;  %1970 = vmatpush3.bf16.msra.mxu0 %v1967_v46 }
 0x328   :  { %1972 = vmatprep.subr.bf16.mxu0 %v1971_v49 }
 0x329   :  { %1910 = vmatpush3.bf16.msra.mxu1 %v1907_v19  ;;  %v1955_v19 = vpack.c.bf16 %v1101_v18, %v1100_v17  ;;  %v1448_v18 = vld [vmem:[#allocation21] ss:$0 sm:$0xff] }
 0x32a   :  { %1912 = vmatprep.subr.bf16.mxu1 %v1911_v23 }
 0x32b   :  { %1974 = vmatpush3.bf16.msra.mxu0 %v1971_v49 }
 0x32d   :  { %1914 = vmatpush3.bf16.msra.mxu1 %v1911_v23  ;;  %v1959_v23 = vpack.c.bf16 %v1103_v21, %v1102_v20 }
 0x32e   :  { %1916 = vmatprep.subr.bf16.mxu1 %v1915_v27  ;;  %1778 = vmatmul.mubr.msk.f32.vlgmr.msra.gmra.mrb[12].mxu0 %vm414_vm1, %v2736_v30 }
 0x331   :  { %1918 = vmatpush3.bf16.msra.mxu1 %v1915_v27  ;;  %v1963_v27 = vpack.c.bf16 %v1105_v25, %v1104_v24 }
 0x332   :  { %1920 = vmatprep.subr.bf16.mxu1 %v1919_v31 }
 0x335   :  { %1922 = vmatpush3.bf16.msra.mxu1 %v1919_v31 }
 0x336   :  { %1924 = vmatprep.subr.bf16.mxu1 %v1923_v34 }
 0x339   :  { %1926 = vmatpush3.bf16.msra.mxu1 %v1923_v34  ;;  %v1280_v34 = vld [vmem:[#allocation22 + $0x8] sm:$0xff] }
 0x33a   :  { %1936 = vmatprep.subr.bf16.mxu1 %v1935_v37  ;;  %v1975_v35 = vpack.c.bf16 %v1280_v34, %v1279_v33 }
 0x33c   :  { %1976 = vmatprep.subr.bf16.mxu0 %v1975_v35 }
 0x33d   :  { %1978 = vmatpush3.bf16.msra.mxu0 %v1975_v35 }
 0x3f1   :  { %v1687_v53 = vpop.f32.mrb[8].mxu0 }
 0x3f2   :  { %v730_v54 = vadd.f32 %v1687_v53, %v1439_v52  ;;  %v724_v55 = vpop.f32.mrb[9].mxu0 }
 0x3f3   :  { %v725_v56 = vadd.f32 %v1439_v52, %v724_v55 }
 0x3f4   :  { %v1441_v57 = vmul.f32 -1.442695, %v730_v54 }
 0x3f5   :  { %v1440_v58 = vmul.f32 -1.442695, %v725_v56 }
 0x3f6   :  { %2029 = vpow2.f32 %v1441_v57 }
 0x3f7   :  { %2031 = vpow2.f32 %v1440_v58 }
 0x3f9   :  { %v1733_v28 = vpop.f32.mrb[10].mxu0 }
 0x3fa   :  { %v997_v29 = vpop.f32.mrb[11].mxu0 }
 0x400   :  { %v2030_v59 = vpop.eup %2029 }
 0x401   :  { %v2032_v60 = vpop.eup %2031  ;;  %v740_v61 = vadd.f32 1.0, %v2030_v59  ;;  %v1779_v31 = vpop.f32.mrb[12].mxu0 }
 0x402   :  { %v739_v62 = vadd.f32 1.0, %v2032_v60  ;;  %v1247_v32 = vpop.f32.mrb[13].mxu0  ;;  %v1443_v60 = vld [vmem:[#allocation19] ss:$0 sm:$0xff] }
 0x403   :  { %2033 = vrcp.f32 %v740_v61  ;;  %v998_v61 = vadd.f32 %v1443_v60, %v997_v29 }
 0x404   :  { %2035 = vrcp.f32 %v739_v62 }
 0x405   :  { %v1446_v62 = vmul.f32 -1.442695, %v998_v61 }
 0x40d   :  { %v2034_v63 = vpop.eup %2033 }
 0x40e   :  { %v2036_v3 = vpop.eup %2035  ;;  %v746_v6 = vmul.f32 %v2034_v63, %v730_v54  ;;  %v1003_v63 = vadd.f32 %v1733_v28, %v1443_v60 }
 0x40f   :  { %v745_v5 = vmul.f32 %v2036_v3, %v725_v56 }
 0x411   :  { %1720 = vmatprep.mubr.f32.mxu1 %v745_v5 }
 0x412   :  { %1721 = vmatmul.mubr.f32.vlgmr.msra.gmra.mrb[2].mxu1 %v746_v6  ;;  %v1447_v6 = vmul.f32 -1.442695, %v1003_v63 }
 0x413   :  { %1938 = vmatpush3.bf16.msra.mxu1 %v1935_v37  ;;  %1766 = vmatprep.mubr.f32.mxu1 %v2814_v8  ;;  %v1099_v8 = vld [vmem:[%s3014_s18 + $0x48] sm:$0xff]  ;;  %s2375_s18 = smov 12  }
 0x414   :  { %1940 = vmatprep.subr.bf16.mxu1 %v1939_v9  ;;  %v1951_v16 = vpack.c.bf16 %v1099_v8, %v1098_v15  ;;  %v1282_v37 = vld [vmem:[#allocation22 + $0x18] sm:$0xff] }
 0x415   :  { %v1979_v38 = vpack.c.bf16 %v1282_v37, %v1281_v36 }
 0x417   :  { %1942 = vmatpush3.bf16.msra.mxu1 %v1939_v9  ;;  %1980 = vmatprep.subr.bf16.mxu0 %v1979_v38 }
 0x418   :  { %1944 = vmatprep.subr.bf16.mxu1 %v1943_v2  ;;  %1982 = vmatpush3.bf16.msra.mxu0 %v1979_v38 }
 0x41b   :  { %1946 = vmatpush3.bf16.msra.mxu1 %v1943_v2 }
 0x41c   :  { %1948 = vmatprep.subr.bf16.mxu1 %v1947_v14 }
 0x41f   :  { %1950 = vmatpush3.bf16.msra.mxu1 %v1947_v14 }
 0x420   :  { %1952 = vmatprep.subr.bf16.mxu1 %v1951_v16 }
 0x423   :  { %1954 = vmatpush3.bf16.msra.mxu1 %v1951_v16 }
 0x424   :  { %1956 = vmatprep.subr.bf16.mxu1 %v1955_v19 }
 0x427   :  { %1958 = vmatpush3.bf16.msra.mxu1 %v1955_v19 }
 0x428   :  { %1960 = vmatprep.subr.bf16.mxu1 %v1959_v23 }
 0x42b   :  { %1962 = vmatpush3.bf16.msra.mxu1 %v1959_v23 }
 0x42c   :  { %1964 = vmatprep.subr.bf16.mxu1 %v1963_v27 }
 0x42f   :  { %1966 = vmatpush3.bf16.msra.mxu1 %v1963_v27 }
 0x432   :  { %1767 = vmatmul.mubr.f32.vlgmr.msra.gmra.mrb[4].mxu1 %v2811_v7 }
 0x4e5   :  { %v1722_v40 = vpop.f32.mrb[2].mxu1 }
 0x4e6   :  { %v845_v41 = vadd.f32 %v1722_v40, %v771_v39  ;;  %v839_v42 = vpop.f32.mrb[3].mxu1  ;;  %v1457_v40 = vld [vmem:[%s3017_s21] ss:$0 sm:$0xff]  ;;  %s2379_s21 = smov 20  }
 0x4e7   :  { %v840_v43 = vadd.f32 %v839_v42, %v771_v39 }
 0x4e8   :  { %871 = vrot.lane.b32.xlu1 %v845_v41, %s2362_s28 }
 0x4e9   :  { %869 = vrot.lane.b32.xlu0 %v840_v43, %s2362_s28 }
 0x4ec   :  { %893 = vrot.lane.b32.xlu1 %v840_v43, %s2375_s18 }
 0x4ed   :  { %895 = vrot.lane.b32.xlu0 %v845_v41, %s2375_s18 }
 0x4f0   :  { %848 = vrot.lane.b32.xlu1 %v2712_v13, %s2376_s4 }
 0x4f1   :  { %850 = vrot.lane.b32.xlu0 %v2722_v22, %s2376_s4 }
 0x505   :  { %v1768_v7 = vpop.f32.mrb[4].mxu1 }
 0x506   :  { %v1253_v45 = vadd.f32 %v1779_v31, %v1768_v7  ;;  %v1172_v46 = vpop.f32.mrb[5].mxu1 }
 0x507   :  { %v1248_v47 = vadd.f32 %v1247_v32, %v1172_v46  ;;  %v1449_v46 = vld [vmem:[#allocation3] ss:$0 sm:$0xff] }
 0x508   :  { %v1264_v48 = vadd.f32 %v1452_v44, %v1253_v45 }
 0x509   :  { %v1263_v49 = vadd.f32 %v1452_v44, %v1248_v47 }
 0x50a   :  { %v1454_v50 = vmul.f32 -1.442695, %v1264_v48 }
 0x50b   :  { %v1453_v51 = vmul.f32 -1.442695, %v1263_v49 }
 0x50c   :  { %2037 = vpow2.f32 %v1454_v50 }
 0x50d   :  { %2039 = vpow2.f32 %v1453_v51 }
 0x516   :  { %v2038_v52 = vpop.eup %2037 }
 0x517   :  { %v2040_v53 = vpop.eup %2039  ;;  %v1272_v54 = vadd.f32 1.0, %v2038_v52 }
 0x518   :  { %v1271_v55 = vadd.f32 1.0, %v2040_v53 }
 0x519   :  { %2041 = vrcp.f32 %v1272_v54 }
 0x51a   :  { %2043 = vrcp.f32 %v1271_v55 }
 0x51b   :  { %2045 = vpow2.f32 %v1446_v62 }
 0x51c   :  { %2047 = vpow2.f32 %v1447_v6 }
 0x523   :  { %v2042_v56 = vpop.eup %2041 }
 0x524   :  { %v2044_v57 = vpop.eup %2043  ;;  %v1278_v59 = vmul.f32 %v2042_v56, %v1264_v48 }
 0x525   :  { %v1277_v58 = vmul.f32 %v2044_v57, %v1263_v49  ;;  %v2046_v11 = vpop.eup %2045 }
 0x526   :  { %v1012_v12 = vadd.f32 1.0, %v2046_v11  ;;  %v2048_v14 = vpop.eup %2047 }
 0x527   :  { %1788 = vmatprep.mubr.msk.f32.mxu0 %vm414_vm1, %v1277_v58  ;;  %v1013_v15 = vadd.f32 1.0, %v2048_v14 }
 0x528   :  { %1789 = vmatmul.mubr.msk.f32.vlgmr.msra.gmra.mrb[14].mxu0 %vm414_vm1, %v1278_v59  ;;  %2049 = vrcp.f32 %v1012_v12 }
 0x529   :  { %2051 = vrcp.f32 %v1013_v15 }
 0x532   :  { %v2050_v8 = vpop.eup %2049 }
 0x533   :  { %v1018_v16 = vmul.f32 %v2050_v8, %v998_v61  ;;  %v2052_v19 = vpop.eup %2051 }
 0x534   :  { %v1019_v23 = vmul.f32 %v2052_v19, %v1003_v63 }
 0x535   :  { %v1027_v21 = vmul.f32 %v1448_v18, %v1018_v16 }
 0x536   :  { %v1028_v28 = vmul.f32 %v1448_v18, %v1019_v23 }
 0x537   :  { %v1029_v25 = vsel %vm414_vm1, %v1027_v21, 0.0 }
 0x538   :  { %v1032_v29 = vsel %vm414_vm1, %v1028_v28, 0.0 }
 0x55a   :  { %v872_v0 = vpop.permute.xlu1 %871 }
 0x55b   :  { %v876_v1 = vmul.f32 %v872_v0, %v2722_v22  ;;  %v870_v3 = vpop.permute.xlu0 %869 }
 0x55c   :  { %v875_v5 = vmul.f32 %v870_v3, %v2712_v13 }
 0x55d   :  { %881 = vrot.lane.b32.xlu0 %v876_v1, %s2377_s19 }
 0x55e   :  { %v894_v9 = vpop.permute.xlu1 %893  ;;  %879 = vrot.lane.b32.xlu1 %v875_v5, %s2377_s19 }
 0x55f   :  { %v899_v10 = vmul.f32 %v894_v9, %v2712_v13  ;;  %v896_v4 = vpop.permute.xlu0 %895 }
 0x560   :  { %v900_v2 = vmul.f32 %v896_v4, %v2722_v22 }
 0x562   :  { %903 = vrot.lane.b32.xlu1 %v899_v10, %s2378_s16  ;;  %905 = vrot.lane.b32.xlu0 %v900_v2, %s2378_s16  ;;  %v849_v24 = vpop.permute.xlu1 %848 }
 0x563   :  { %v851_v17 = vpop.permute.xlu0 %850  ;;  %v855_v27 = vsel %vm854_vm2, %v849_v24, 0.0 }
 0x564   :  { %v858_v20 = vsel %vm854_vm2, %v851_v17, 0.0 }
 0x581   :  { %859 = vadd.xlane.f32.xlu0 %v858_v20 }
 0x585   :  { %1030 = vadd.xlane.f32.xlu0 %v1029_v25 }
 0x586   :  { %856 = vadd.xlane.f32.xlu1 %v855_v27 }
 0x58a   :  { %1033 = vadd.xlane.f32.xlu1 %v1032_v29 }
 0x5cf   :  { %v882_v31 = vpop.permute.xlu0 %881 }
 0x5d0   :  { %v880_v32 = vpop.permute.xlu1 %879  ;;  %v888_v33 = vsel %vm854_vm2, %v882_v31, 0.0 }
 0x5d1   :  { %889 = vadd.xlane.f32.xlu1 %v888_v33  ;;  %v885_v34 = vsel %vm854_vm2, %v880_v32, 0.0 }
 0x5d2   :  { %886 = vadd.xlane.f32.xlu0 %v885_v34 }
 0x5d4   :  { %v904_v35 = vpop.permute.xlu1 %903  ;;  %v906_v36 = vpop.permute.xlu0 %905 }
 0x5d5   :  { %v909_v37 = vsel %vm854_vm2, %v904_v35, 0.0  ;;  %v912_v38 = vsel %vm854_vm2, %v906_v36, 0.0 }
 0x5d6   :  { %910 = vadd.xlane.f32.xlu0 %v909_v37  ;;  %913 = vadd.xlane.f32.xlu1 %v912_v38 }
 0x5fb   :  { %v1790_v39 = vpop.f32.mrb[14].mxu0 }
 0x5fc   :  { %v1365_v41 = vadd.f32 %v1790_v39, %v2736_v30  ;;  %v1355_v42 = vpop.f32.mrb[15].mxu0 }
 0x5fd   :  { %v1364_v43 = vadd.f32 %v1355_v42, %v2724_v26 }
 0x5fe   :  { %v1374_v7 = vadd.f32 %v1457_v40, %v1365_v41 }
 0x5ff   :  { %v1373_v44 = vadd.f32 %v1457_v40, %v1364_v43 }
 0x600   :  { %1376 = vst.msk [vmem:[#allocation24 + $0x8] sm:$0xff] %vm414_vm1, %v1374_v7 }
 0x601   :  { %1375 = vst.msk [vmem:[#allocation24] sm:$0xff] %vm414_vm1, %v1373_v44 }
 0x60e   :  { %v860_v45 = vpop.xlane.xlu0 %859 }
 0x60f   :  { %v862_v52 = vadd.f32 1e-06, %v860_v45 }
 0x611   :  { %2053 = vrcp.f32 %v862_v52 }
 0x612   :  { %v1031_v47 = vpop.xlane.xlu0 %1030 }
 0x613   :  { %v1042_v48 = vadd.f32 %v1449_v46, %v1031_v47  ;;  %v857_v49 = vpop.xlane.xlu1 %856 }
 0x614   :  { %v861_v30 = vadd.f32 1e-06, %v857_v49 }
 0x615   :  { %1046 = vperm.xlu0 %2011, %v1042_v48  }
 0x616   :  { %2055 = vrcp.f32 %v861_v30 }
 0x617   :  { %v1034_v50 = vpop.xlane.xlu1 %1033 }
 0x618   :  { %v1043_v51 = vadd.f32 %v1449_v46, %v1034_v50 }
 0x61a   :  { %1051 = vperm.xlu1 %2012, %v1043_v51  }
 0x61b   :  { %v2054_v54 = vpop.eup %2053 }
 0x620   :  { %v2056_v55 = vpop.eup %2055 }
 0x65e   :  { %v890_v26 = vpop.xlane.xlu1 %889 }
 0x65f   :  { %v887_v53 = vpop.xlane.xlu0 %886  ;;  %v892_v58 = vmul.f32 %v2054_v54, %v890_v26 }
 0x660   :  { %v891_v59 = vmul.f32 %v2056_v55, %v887_v53 }
 0x663   :  { %v914_v56 = vpop.xlane.xlu1 %913  ;;  %v911_v57 = vpop.xlane.xlu0 %910 }
 0x664   :  { %v916_v60 = vmul.f32 %v2054_v54, %v914_v56  ;;  %v915_v61 = vmul.f32 %v2056_v55, %v911_v57 }
 0x666   :  { %v919_v62 = vsel %vm917_vm3, %v892_v58, %v916_v60  ;;  %v918_v63 = vsel %vm917_vm3, %v891_v59, %v915_v61 }
 0x667   :  { %1060 = vrot.lane.b32.xlu0 %v919_v62, %s2379_s21  ;;  %1058 = vrot.lane.b32.xlu1 %v918_v63, %s2379_s21 }
 0x694   :  { %v1047_v0 = vpop.permute.xlu0 %1046 }
 0x695   :  { %v1054_v3 = vmul.f32 %v1047_v0, %v2712_v13 }
 0x699   :  { %v1052_v1 = vpop.permute.xlu1 %1051 }
 0x69a   :  { %v1055_v5 = vmul.f32 %v1052_v1, %v2722_v22 }
 0x6d9   :  { %v1059_v6 = vpop.permute.xlu1 %1058  ;;  %v1061_v9 = vpop.permute.xlu0 %1060 }
 0x6da   :  { %v1064_v10 = vadd.f32 %v1059_v6, %v1054_v3  ;;  %v1065_v4 = vadd.f32 %v1061_v9, %v1055_v5 }
 0x6dc   :  { %1068 = vrot.lane.b32.xlu1 %v1064_v10, %s2380_s30  ;;  %1070 = vrot.lane.b32.xlu0 %v1065_v4, %s2380_s30 }
 0x74e   :  { %v1069_v2 = vpop.permute.xlu1 %1068  ;;  %v1071_v11 = vpop.permute.xlu0 %1070 }
 0x74f   :  { %v1074_v12 = vadd.f32 %v1069_v2, %v2712_v13  ;;  %v1075_v14 = vadd.f32 %v1071_v11, %v2722_v22 }
 0x751   :  { %1078 = vrot.lane.b32.xlu1 %v1074_v12, %s2380_s30  ;;  %1080 = vrot.lane.b32.xlu0 %v1075_v14, %s2380_s30 }
 0x755   :  { %1388 = vrot.lane.b32.xlu1 %v1074_v12, %s2381_s2  ;;  %1390 = vrot.lane.b32.xlu0 %v1075_v14, %s2381_s2 }
 0x7c3   :  { %v1079_v15 = vpop.permute.xlu1 %1078  ;;  %v1081_v8 = vpop.permute.xlu0 %1080 }
 0x7c4   :  { %v1084_v16 = vadd.f32 %v1079_v15, %v2712_v13  ;;  %v1085_v17 = vadd.f32 %v1081_v8, %v2722_v22 }
 0x7c6   :  { %1379 = vrot.lane.b32.xlu1 %v1084_v16, %s2381_s2  ;;  %1381 = vrot.lane.b32.xlu0 %v1085_v17, %s2381_s2 }
 0x7c7   :  { %v1389_v18 = vpop.permute.xlu1 %1388  ;;  %v1391_v19 = vpop.permute.xlu0 %1390 }
 0x7ca   :  { %1397 = vrot.lane.b32.xlu1 %v1064_v10, %s2381_s2  ;;  %1399 = vrot.lane.b32.xlu0 %v1065_v4, %s2381_s2 }
 0x838   :  { %v1380_v20 = vpop.permute.xlu1 %1379  ;;  %v1382_v21 = vpop.permute.xlu0 %1381 }
 0x839   :  { %1386 = vst.msk [vmem:[#allocation24] sm:$0xff] %vm1385_vm4, %v1380_v20  ;;  %1387 = vst.msk [vmem:[#allocation24 + $0x8] sm:$0xff] %vm1385_vm4, %v1382_v21 }
 0x83a   :  { %1395 = vst.msk [vmem:[#allocation24] sm:$0xff] %vm1394_vm5, %v1389_v18  ;;  %1396 = vst.msk [vmem:[#allocation24 + $0x8] sm:$0xff] %vm1394_vm5, %v1391_v19 }
 0x83c   :  { %v1398_v13 = vpop.permute.xlu1 %1397  ;;  %v1400_v22 = vpop.permute.xlu0 %1399 }
 0x83d   :  { %1404 = vst.msk [vmem:[#allocation24] sm:$0xff] %vm1403_vm6, %v1398_v13  ;;  %1405 = vst.msk [vmem:[#allocation24 + $0x8] sm:$0xff] %vm1403_vm6, %v1400_v22 }
 0x83e   :  { %2332 = shalt.err (!%p2329_p2)
}
 0x83f   :  { %s3043_s12 = sld [smem:[#allocation40_spill]] }
 0x845   :  { %s2333_s27 = scalar_lea.hbm %s3043_s12, 256 }
 0x846   :  { %p2334_p3 = scmp.ne.s32.totalorder %s3043_s12, %s2333_s27  ;;  %p2337_p4 = scmp.lt.u32.totalorder %s2333_s27, %s3043_s12 }
 0x848   :  { %p2339_p5 = pnand %p2337_p4, %p2334_p3 }
 0x84a   :  { %2342 = shalt.err (!%p2339_p5)
}
 0x84b   :  { %1417 = dma.vmem_to_hbm [thread:$0]  %s1412_s22, 256, %s3043_s12, [#allocation6], %s2361_s3, %s2361_s3, %s2362_s28  }
 0x84c   :  { %2357 = dma.done.wait [#allocation6], 256  }
 0x84d   :  { %2358 = vsyncadd [#allocation6], 4294967040 }
 0x84e   :  { %1421 = vsyncpa [#allocation5], 1 }
 0x84f   :  { %1422 = vsyncpa [#allocation8], 1 }
 0x850   :  { %1423 = vsyncpa [#allocation11], 1 }
 0x851   :  { %1424 = vsyncpa [#allocation14], 1 }
 0x852   :  { %1425 = vsyncpa [#allocation17], 1 }
 0x853   :  { %1426 = vsyncpa [#allocation20], 1 }
 0x854   :  { %1427 = vsyncpa [#allocation23], 1 }
 0x855   :  { %1428 = vsyncpa [#allocation6], 1 }

</bundles_post_ra>
